<compile_context>
chip_gen: v5e
topology: v5e:2x2
jax: 0.10.0
libtpu: 0.0.40
codegen_flags: <defaults>
</compile_context>

<pallas_src>
import functools

import jax
import jax.numpy as jnp
import numpy as np
from jax import lax
from jax.experimental import pallas as pl
from jax.experimental.pallas import tpu as pltpu


def pam_kernel(q_ref, k_ref, xkv_ref, xres_ref, gamma_ref, out_ref,
               m_scr, l_scr, acc_scr, *, n_valid, masked, bf16_exp):
    ki = pl.program_id(2)
    nk = pl.num_programs(2)

    @pl.when(ki == 0)
    def _init():
        m_scr[...] = jnp.full(m_scr.shape, -jnp.inf, dtype=m_scr.dtype)
        l_scr[...] = jnp.zeros(l_scr.shape, dtype=l_scr.dtype)
        acc_scr[...] = jnp.zeros(acc_scr.shape, dtype=acc_scr.dtype)

    q = q_ref[0]                                   # (Cqp, TQ) bf16, projected queries
    k = k_ref[0]                                   # (Cqp, TK) bf16, projected keys
    x_kv = xkv_ref[0]                              # (C,   TK) bf16, value tile (= x)

    # Energy tile s[j, i] = sum_c k[c, j] * q[c, i]  -> (TK, TQ).
    # dot_general contracting dim 0 with dim 0: no XLU transposes anywhere.
    s = lax.dot_general(k, q, dimension_numbers=(((0,), (0,)), ((), ())),
                        preferred_element_type=jnp.float32)

    if masked:
        # Keys beyond the true spatial size are zero padding: mask them out.
        col = lax.broadcasted_iota(jnp.int32, s.shape, 0) + ki * s.shape[0]
        s = jnp.where(col < n_valid, s, -jnp.inf)

    # Online softmax over the key axis (axis 0); stats shaped (1, TQ) so they
    # broadcast straight onto the (C, TQ) accumulator without any transpose.
    m_new = jnp.maximum(m_scr[...], jnp.max(s, axis=0, keepdims=True))     # (1, TQ)
    alpha = jnp.exp(m_scr[...] - m_new)                                    # (1, TQ)
    if bf16_exp:
        # bf16 EUP exp path (v6e/v7x); l accumulation stays f32.
        p = jnp.exp((s - m_new).astype(jnp.bfloat16))                      # (TK, TQ) bf16
        l_scr[...] = alpha * l_scr[...] + jnp.sum(p, axis=0, keepdims=True,
                                                  dtype=jnp.float32)
    else:
        p_f32 = jnp.exp(s - m_new)                                         # (TK, TQ) f32
        l_scr[...] = alpha * l_scr[...] + jnp.sum(p_f32, axis=0, keepdims=True)
        p = p_f32.astype(jnp.bfloat16)

    # Value aggregation: acc[c, i] += sum_j x[c, j] * p[j, i]   (value == x).
    pv = jnp.dot(x_kv, p, preferred_element_type=jnp.float32)              # (C, TQ)
    acc_scr[...] = alpha * acc_scr[...] + pv
    m_scr[...] = m_new

    @pl.when(ki == nk - 1)
    def _finalize():
        gamma = gamma_ref[0, 0]
        inv_l = pl.reciprocal(l_scr[...], approx=True)                     # EUP slot
        out = gamma * (acc_scr[...] * inv_l) + xres_ref[0].astype(jnp.float32)
        out_ref[0] = out.astype(out_ref.dtype)


def _round_up(x, m):
    return -(-x // m) * m


def _pick_tile(n, candidates):
    """Largest lane-dense (multiple-of-128) tile that divides n."""
    for t in candidates:
        if n % t == 0:
            return t
    return 128  # unreachable: n is always a multiple of 128 here


def _vmem_limit_bytes(C, Cqp, tq, tk, out_itemsize, res_itemsize):
    need = (
        Cqp * tq * 2                 # Q tile (bf16, single-buffered)
        + 2 * Cqp * tk * 2           # K tiles (bf16, double-buffered)
        + 3 * C * tk * 2             # value tiles (bf16, up to triple-buffered)
        + C * tq * res_itemsize      # residual tile (single-buffered)
        + 2 * C * tq * out_itemsize  # output tiles (double-buffered)
        + C * tq * 4 + 2 * tq * 4    # f32 accumulator + m/l scratch
        + 2 * tk * tq * 4            # s / p temporaries
    )
    # 2x margin for Mosaic-internal scratch; never request all of v7x's 64 MiB.
    return int(min(max(2 * need + (8 << 20), 32 << 20), 48 << 20))


def pam_forward(x, wq, bq, wk, bk, gamma, *, tq=None, tk=None):
    """x: (B, C, H, W).  wq/wk: (Cq, C) 1x1-conv weights, bq/bk: (Cq,), gamma: (1,)."""
    B, C, H, W = x.shape
    N = H * W
    Cq = wq.shape[0]
    Np = _round_up(N, 128)

    # Asymmetric tiles: big query tile (amortizes kv re-streaming, ~0.35 us/step grid
    # overhead), moderate key tile (bounds (tk, tq) temporaries / per-step exp work).
    tq = _pick_tile(Np, (1024, 768, 512, 384, 256, 128)) if tq is None else tq
    tk = _pick_tile(Np, (512, 256, 128)) if tk is None else tk
    assert Np % tq == 0 and Np % tk == 0, "tiles must divide the padded spatial size"

    # bf16 packs 16 sublanes per vreg: pad the projection-channel dim to 16.
    # Zero rows contribute exactly 0 energy, so numerics are unchanged.
    Cqp = max(16, _round_up(Cq, 16))

    xf = x.reshape(B, C, N)
    if Np != N:
        xf = jnp.pad(xf, ((0, 0), (0, 0), (0, Np - N)))

    # Hoist the 1x1-conv Q/K projections out of the attention kernel (computed once
    # per batch instead of once per query tile / per (q, k) tile).
    xf32 = xf.astype(jnp.float32)
    q = jnp.einsum('oc,bcn->bon', wq.astype(jnp.float32), xf32) \
        + bq.astype(jnp.float32)[None, :, None]
    k = jnp.einsum('oc,bcn->bon', wk.astype(jnp.float32), xf32) \
        + bk.astype(jnp.float32)[None, :, None]
    pad_c = ((0, 0), (0, Cqp - Cq), (0, 0))
    q_b = jnp.pad(q, pad_c).astype(jnp.bfloat16)       # (B, Cqp, Np)
    k_b = jnp.pad(k, pad_c).astype(jnp.bfloat16)       # (B, Cqp, Np)
    x_kv = xf.astype(jnp.bfloat16)                     # bf16 value stream (dominant traffic)
    x_res = xf                                         # residual stays in x.dtype
    gamma2 = gamma.reshape(1, 1).astype(jnp.float32)

    kind = jax.devices()[0].device_kind.lower()
    is_v5e = ("v5 lite" in kind) or ("v5e" in kind) or ("v5lite" in kind)
    bf16_exp = not is_v5e   # bf16 EUP exp only pays off on v6e / v7x

    kernel = functools.partial(pam_kernel, n_valid=N, masked=(Np != N),
                               bf16_exp=bf16_exp)
    grid = (B, Np // tq, Np // tk)
    out_itemsize = jnp.dtype(x.dtype).itemsize
    res_itemsize = jnp.dtype(x_res.dtype).itemsize

    def call(buffer_hints):
        def spec(shape, idx, mode=None):
            if buffer_hints and mode is not None:
                return pl.BlockSpec(shape, idx, pipeline_mode=mode)
            return pl.BlockSpec(shape, idx)

        kv_mode = pl.Buffered(3) if is_v5e else None   # deeper kv buffering on v5e
        return pl.pallas_call(
            kernel,
            out_shape=jax.ShapeDtypeStruct((B, C, Np), x.dtype),
            grid=grid,
            in_specs=[
                # Q tile: index constant along the key axis -> single buffer.
                spec((1, Cqp, tq), lambda b, qi, ki: (b, 0, qi), pl.Buffered(1)),
                spec((1, Cqp, tk), lambda b, qi, ki: (b, 0, ki)),            # K tile
                spec((1, C, tk), lambda b, qi, ki: (b, 0, ki), kv_mode),     # value (bf16)
                # Residual tile: index constant along the key axis -> single buffer.
                spec((1, C, tq), lambda b, qi, ki: (b, 0, qi), pl.Buffered(1)),
                pl.BlockSpec(memory_space=pltpu.MemorySpace.SMEM),           # gamma
            ],
            out_specs=pl.BlockSpec((1, C, tq), lambda b, qi, ki: (b, 0, qi)),
            scratch_shapes=[
                pltpu.VMEM((1, tq), jnp.float32),      # running max  m
                pltpu.VMEM((1, tq), jnp.float32),      # running sum  l
                pltpu.VMEM((C, tq), jnp.float32),      # output accumulator
            ],
            compiler_params=pltpu.CompilerParams(
                dimension_semantics=("parallel", "parallel", "arbitrary"),
                vmem_limit_bytes=_vmem_limit_bytes(C, Cqp, tq, tk,
                                                   out_itemsize, res_itemsize)),
        )(q_b, k_b, x_kv, x_res, gamma2)

    try:
        out_flat = call(buffer_hints=True)
    except Exception:  # pragma: no cover — fallback if pipeline_mode hints unsupported
        out_flat = call(buffer_hints=False)

    return out_flat[..., :N].reshape(B, C, H, W)


def pam_reference(x, wq, bq, wk, bk, gamma):
    """Pure-JAX f32 reference mirroring the PyTorch forward."""
    B, C, H, W = x.shape
    N = H * W
    xf = x.reshape(B, C, N).astype(jnp.float32)
    q = jnp.einsum('oc,bcn->bon', wq, xf) + bq[None, :, None]   # (B, Cq, N)
    k = jnp.einsum('oc,bcn->bon', wk, xf) + bk[None, :, None]   # (B, Cq, N)
    energy = jnp.einsum('bcn,bcm->bnm', q, k)                   # (B, N, N)
    attn = jax.nn.softmax(energy, axis=-1)
    out = jnp.einsum('bcn,bmn->bcm', xf, attn)                  # (B, C, N)
    out = out.reshape(B, C, H, W)
    return gamma[0] * out + x


if __name__ == "__main__":
    def run_case(B, C, H, W, tq=None, tk=None):
        Cq = max(1, C // 8)
        key = jax.random.PRNGKey(0)
        kx, kwq, kbq, kwk, kbk = jax.random.split(key, 5)
        x = jax.random.normal(kx, (B, C, H, W), dtype=jnp.float32)
        # Conv2d(in_dim, in_dim//8, kernel_size=1) weights: (Cq, C, 1, 1) -> (Cq, C)
        wq = jax.random.normal(kwq, (Cq, C), dtype=jnp.float32) * 0.1
        bq = jax.random.normal(kbq, (Cq,), dtype=jnp.float32) * 0.1
        wk = jax.random.normal(kwk, (Cq, C), dtype=jnp.float32) * 0.1
        bk = jax.random.normal(kbk, (Cq,), dtype=jnp.float32) * 0.1
        # TODO(synk): value_conv is declared in __init__ but never used by forward();
        # it is intentionally omitted here.  gamma is nn.Parameter(zeros(1)); use a
        # non-zero value so the attention path contributes under test.
        gamma = jnp.array([0.5], dtype=jnp.float32)

        out = jax.block_until_ready(pam_forward(x, wq, bq, wk, bk, gamma, tq=tq, tk=tk))
        ref = pam_reference(x, wq, bq, wk, bk, gamma)
        # bf16 MXU operands / bf16 exp (f32 accumulation) => looser tolerance than f32.
        np.testing.assert_allclose(np.asarray(out), np.asarray(ref),
                                   rtol=2e-2, atol=2e-2)

    # N = 256 with 128 tiles: 2 query-tiles x 2 key-tiles per batch element,
    # exercising the multi-tile online-softmax path.
    run_case(B=2, C=16, H=16, W=16, tq=128, tk=128)
    # N = 144 (not a multiple of 128): exercises the pad-to-256 + key-mask path.
    run_case(B=1, C=16, H=12, W=12, tq=128, tk=128)
    print("KERNEL_OK")
</pallas_src>

<mosaic_0001>
module attributes {stable_mosaic.version = 11 : i64} {
  func.func @pam_kernel(%arg0: i32, %arg1: i32, %arg2: i32, %arg3: memref<1x16x128xbf16, #tpu.memory_space<vmem>>, %arg4: memref<1x16x128xbf16, #tpu.memory_space<vmem>>, %arg5: memref<1x16x128xbf16, #tpu.memory_space<vmem>>, %arg6: memref<1x16x128xf32, #tpu.memory_space<vmem>>, %arg7: memref<1x1xf32, #tpu.memory_space<smem>>, %arg8: memref<1x16x128xf32, #tpu.memory_space<vmem>>, %arg9: memref<1x128xf32, #tpu.memory_space<vmem>>, %arg10: memref<1x128xf32, #tpu.memory_space<vmem>>, %arg11: memref<16x128xf32, #tpu.memory_space<vmem>>) attributes {dimension_semantics = [#tpu.dimension_semantics<parallel>, #tpu.dimension_semantics<parallel>, #tpu.dimension_semantics<arbitrary>], iteration_bounds = array<i64: 2, 2, 2>, scalar_prefetch = 0 : i64, scratch_operands = 3 : i64, tpu.core_type = #tpu.core_type<tc>, window_params = [{pipeline_mode = #tpu.pipeline_mode<synchronous>, transform_indices = @transform_0, window_bounds = array<i64: 1, 16, 128>}, {transform_indices = @transform_1, window_bounds = array<i64: 1, 16, 128>}, {transform_indices = @transform_2, window_bounds = array<i64: 1, 16, 128>}, {pipeline_mode = #tpu.pipeline_mode<synchronous>, transform_indices = @transform_3, window_bounds = array<i64: 1, 16, 128>}, {transform_indices = @transform_4, window_bounds = array<i64: 1, 1>}, {transform_indices = @transform_5, window_bounds = array<i64: 1, 16, 128>}]} {
    %c0_i32 = arith.constant 0 : i32
    %0 = arith.cmpi eq, %arg2, %c0_i32 : i32
    %1 = arith.extui %0 : i1 to i32
    %c0_i32_0 = arith.constant 0 : i32
    %2 = arith.cmpi ne, %1, %c0_i32_0 : i32
    scf.if %2 {
      %cst_27 = arith.constant 0xFF800000 : f32
      %38 = vector.broadcast %cst_27 : f32 to vector<1x128xf32>
      %c0_28 = arith.constant 0 : index
      %c0_29 = arith.constant 0 : index
      %39 = vector.load %arg9[%c0_28, %c0_29] : memref<1x128xf32, #tpu.memory_space<vmem>>, vector<1x128xf32>
      tpu.vector_store %arg9[%c0_28, %c0_29], %38 {strides = array<i32>} : memref<1x128xf32, #tpu.memory_space<vmem>>, vector<1x128xf32>,
      %cst_30 = arith.constant 0.000000e+00 : f32
      %40 = vector.broadcast %cst_30 : f32 to vector<1x128xf32>
      %c0_31 = arith.constant 0 : index
      %c0_32 = arith.constant 0 : index
      %41 = vector.load %arg10[%c0_31, %c0_32] : memref<1x128xf32, #tpu.memory_space<vmem>>, vector<1x128xf32>
      tpu.vector_store %arg10[%c0_31, %c0_32], %40 {strides = array<i32>} : memref<1x128xf32, #tpu.memory_space<vmem>>, vector<1x128xf32>,
      %cst_33 = arith.constant 0.000000e+00 : f32
      %42 = vector.broadcast %cst_33 : f32 to vector<16x128xf32>
      %c0_34 = arith.constant 0 : index
      %c0_35 = arith.constant 0 : index
      %43 = vector.load %arg11[%c0_34, %c0_35] : memref<16x128xf32, #tpu.memory_space<vmem>>, vector<16x128xf32>
      tpu.vector_store %arg11[%c0_34, %c0_35], %42 {strides = array<i32>} : memref<16x128xf32, #tpu.memory_space<vmem>>, vector<16x128xf32>,
    } else {
    }
    %c0 = arith.constant 0 : index
    %c0_1 = arith.constant 0 : index
    %c0_2 = arith.constant 0 : index
    %3 = vector.load %arg3[%c0, %c0_1, %c0_2] : memref<1x16x128xbf16, #tpu.memory_space<vmem>>, vector<1x16x128xbf16>
    %4 = vector.shape_cast %3 : vector<1x16x128xbf16> to vector<16x128xbf16>
    %c0_3 = arith.constant 0 : index
    %c0_4 = arith.constant 0 : index
    %c0_5 = arith.constant 0 : index
    %5 = vector.load %arg4[%c0_3, %c0_4, %c0_5] : memref<1x16x128xbf16, #tpu.memory_space<vmem>>, vector<1x16x128xbf16>
    %6 = vector.shape_cast %5 : vector<1x16x128xbf16> to vector<16x128xbf16>
    %c0_6 = arith.constant 0 : index
    %c0_7 = arith.constant 0 : index
    %c0_8 = arith.constant 0 : index
    %7 = vector.load %arg5[%c0_6, %c0_7, %c0_8] : memref<1x16x128xbf16, #tpu.memory_space<vmem>>, vector<1x16x128xbf16>
    %8 = vector.shape_cast %7 : vector<1x16x128xbf16> to vector<16x128xbf16>
    %cst = arith.constant dense<0.000000e+00> : vector<128x128xf32>
    %9 = tpu.matmul %6, %4, %cst {dimension_numbers = #tpu.dot_dimension_numbers<[0], [0], [1], [1], [0, 1, 1, 1], [], []>} : vector<16x128xbf16>, vector<16x128xbf16>, vector<128x128xf32> -> vector<128x128xf32>
    %c0_9 = arith.constant 0 : index
    %c0_10 = arith.constant 0 : index
    %10 = vector.load %arg9[%c0_9, %c0_10] : memref<1x128xf32, #tpu.memory_space<vmem>>, vector<1x128xf32>
    %cst_11 = arith.constant dense<0xFF800000> : vector<128xf32>
    %11 = vector.multi_reduction <maximumf>, %9, %cst_11 [0] : vector<128x128xf32> to vector<128xf32>
    %12 = vector.shape_cast %11 : vector<128xf32> to vector<1x128xf32>
    %13 = arith.maximumf %10, %12 : vector<1x128xf32>
    %c0_12 = arith.constant 0 : index
    %c0_13 = arith.constant 0 : index
    %14 = vector.load %arg9[%c0_12, %c0_13] : memref<1x128xf32, #tpu.memory_space<vmem>>, vector<1x128xf32>
    %15 = arith.subf %14, %13 : vector<1x128xf32>
    %16 = math.exp %15 : vector<1x128xf32>
    %17 = vector.broadcast %13 : vector<1x128xf32> to vector<128x128xf32>
    %18 = arith.subf %9, %17 : vector<128x128xf32>
    %19 = arith.truncf %18 : vector<128x128xf32> to vector<128x128xbf16>
    %20 = math.exp %19 : vector<128x128xbf16>
    %c0_14 = arith.constant 0 : index
    %c0_15 = arith.constant 0 : index
    %21 = vector.load %arg10[%c0_14, %c0_15] : memref<1x128xf32, #tpu.memory_space<vmem>>, vector<1x128xf32>
    %22 = arith.mulf %16, %21 : vector<1x128xf32>
    %23 = arith.extf %20 : vector<128x128xbf16> to vector<128x128xf32>
    %cst_16 = arith.constant dense<0.000000e+00> : vector<128xf32>
    %24 = vector.multi_reduction <add>, %23, %cst_16 [0] : vector<128x128xf32> to vector<128xf32>
    %25 = vector.shape_cast %24 : vector<128xf32> to vector<1x128xf32>
    %26 = arith.addf %22, %25 : vector<1x128xf32>
    %c0_17 = arith.constant 0 : index
    %c0_18 = arith.constant 0 : index
    %27 = vector.load %arg10[%c0_17, %c0_18] : memref<1x128xf32, #tpu.memory_space<vmem>>, vector<1x128xf32>
    tpu.vector_store %arg10[%c0_17, %c0_18], %26 {strides = array<i32>} : memref<1x128xf32, #tpu.memory_space<vmem>>, vector<1x128xf32>,
    %cst_19 = arith.constant dense<0.000000e+00> : vector<16x128xf32>
    %28 = tpu.matmul %8, %20, %cst_19 {dimension_numbers = #tpu.dot_dimension_numbers<[1], [0], [0], [1], [0, 0, 1, 1], [], []>} : vector<16x128xbf16>, vector<128x128xbf16>, vector<16x128xf32> -> vector<16x128xf32>
    %c0_20 = arith.constant 0 : index
    %c0_21 = arith.constant 0 : index
    %29 = vector.load %arg11[%c0_20, %c0_21] : memref<16x128xf32, #tpu.memory_space<vmem>>, vector<16x128xf32>
    %30 = vector.broadcast %16 : vector<1x128xf32> to vector<16x128xf32>
    %31 = arith.mulf %30, %29 : vector<16x128xf32>
    %32 = arith.addf %31, %28 : vector<16x128xf32>
    %c0_22 = arith.constant 0 : index
    %c0_23 = arith.constant 0 : index
    %33 = vector.load %arg11[%c0_22, %c0_23] : memref<16x128xf32, #tpu.memory_space<vmem>>, vector<16x128xf32>
    tpu.vector_store %arg11[%c0_22, %c0_23], %32 {strides = array<i32>} : memref<16x128xf32, #tpu.memory_space<vmem>>, vector<16x128xf32>,
    %c0_24 = arith.constant 0 : index
    %c0_25 = arith.constant 0 : index
    %34 = vector.load %arg9[%c0_24, %c0_25] : memref<1x128xf32, #tpu.memory_space<vmem>>, vector<1x128xf32>
    tpu.vector_store %arg9[%c0_24, %c0_25], %13 {strides = array<i32>} : memref<1x128xf32, #tpu.memory_space<vmem>>, vector<1x128xf32>,
    %c1_i32 = arith.constant 1 : i32
    %35 = arith.cmpi eq, %arg2, %c1_i32 : i32
    %36 = arith.extui %35 : i1 to i32
    %c0_i32_26 = arith.constant 0 : i32
    %37 = arith.cmpi ne, %36, %c0_i32_26 : i32
    scf.if %37 {
      %c0_27 = arith.constant 0 : index
      %c0_28 = arith.constant 0 : index
      %38 = memref.load %arg7[%c0_27, %c0_28] : memref<1x1xf32, #tpu.memory_space<smem>>
      %c0_29 = arith.constant 0 : index
      %c0_30 = arith.constant 0 : index
      %39 = vector.load %arg10[%c0_29, %c0_30] : memref<1x128xf32, #tpu.memory_space<vmem>>, vector<1x128xf32>
      %40 = tpu.reciprocal %39 {approx = true} : vector<1x128xf32> -> vector<1x128xf32>
      %c0_31 = arith.constant 0 : index
      %c0_32 = arith.constant 0 : index
      %41 = vector.load %arg11[%c0_31, %c0_32] : memref<16x128xf32, #tpu.memory_space<vmem>>, vector<16x128xf32>
      %42 = vector.broadcast %40 : vector<1x128xf32> to vector<16x128xf32>
      %43 = arith.mulf %41, %42 : vector<16x128xf32>
      %44 = vector.broadcast %38 : f32 to vector<16x128xf32>
      %45 = arith.mulf %44, %43 : vector<16x128xf32>
      %c0_33 = arith.constant 0 : index
      %c0_34 = arith.constant 0 : index
      %c0_35 = arith.constant 0 : index
      %46 = vector.load %arg6[%c0_33, %c0_34, %c0_35] : memref<1x16x128xf32, #tpu.memory_space<vmem>>, vector<1x16x128xf32>
      %47 = vector.shape_cast %46 : vector<1x16x128xf32> to vector<16x128xf32>
      %48 = arith.addf %45, %47 : vector<16x128xf32>
      %c0_36 = arith.constant 0 : index
      %c0_37 = arith.constant 0 : index
      %c0_38 = arith.constant 0 : index
      %49 = vector.load %arg8[%c0_36, %c0_37, %c0_38] : memref<1x16x128xf32, #tpu.memory_space<vmem>>, vector<1x16x128xf32>
      %50 = vector.shape_cast %49 : vector<1x16x128xf32> to vector<16x128xf32>
      %51 = vector.shape_cast %48 : vector<16x128xf32> to vector<1x16x128xf32>
      tpu.vector_store %arg8[%c0_36, %c0_37, %c0_38], %51 {strides = array<i32>} : memref<1x16x128xf32, #tpu.memory_space<vmem>>, vector<1x16x128xf32>,
    } else {
    }
    return
  }
  func.func @transform_0(%arg0: i32, %arg1: i32, %arg2: i32) -> (i32, i32, i32) {
    %c0_i32 = arith.constant 0 : i32
    %c0_i32_0 = arith.constant 0 : i32
    return %arg0, %c0_i32, %arg1 : i32, i32, i32
  }
  func.func @transform_1(%arg0: i32, %arg1: i32, %arg2: i32) -> (i32, i32, i32) {
    %c0_i32 = arith.constant 0 : i32
    %c0_i32_0 = arith.constant 0 : i32
    return %arg0, %c0_i32, %arg2 : i32, i32, i32
  }
  func.func @transform_2(%arg0: i32, %arg1: i32, %arg2: i32) -> (i32, i32, i32) {
    %c0_i32 = arith.constant 0 : i32
    %c0_i32_0 = arith.constant 0 : i32
    return %arg0, %c0_i32, %arg2 : i32, i32, i32
  }
  func.func @transform_3(%arg0: i32, %arg1: i32, %arg2: i32) -> (i32, i32, i32) {
    %c0_i32 = arith.constant 0 : i32
    %c0_i32_0 = arith.constant 0 : i32
    return %arg0, %c0_i32, %arg1 : i32, i32, i32
  }
  func.func @transform_4(%arg0: i32, %arg1: i32, %arg2: i32) -> (i32, i32) {
    %c0_i32 = arith.constant 0 : i32
    %c0_i32_0 = arith.constant 0 : i32
    %c0_i32_1 = arith.constant 0 : i32
    return %c0_i32, %c0_i32_0 : i32, i32
  }
  func.func @transform_5(%arg0: i32, %arg1: i32, %arg2: i32) -> (i32, i32, i32) {
    %c0_i32 = arith.constant 0 : i32
    %c0_i32_0 = arith.constant 0 : i32
    return %arg0, %c0_i32, %arg1 : i32, i32, i32
  }
}

module attributes {stable_mosaic.version = 11 : i64} {
  func.func @pam_kernel(%arg0: i32, %arg1: i32, %arg2: i32, %arg3: memref<1x16x128xbf16, #tpu.memory_space<vmem>>, %arg4: memref<1x16x128xbf16, #tpu.memory_space<vmem>>, %arg5: memref<1x16x128xbf16, #tpu.memory_space<vmem>>, %arg6: memref<1x16x128xf32, #tpu.memory_space<vmem>>, %arg7: memref<1x1xf32, #tpu.memory_space<smem>>, %arg8: memref<1x16x128xf32, #tpu.memory_space<vmem>>, %arg9: memref<1x128xf32, #tpu.memory_space<vmem>>, %arg10: memref<1x128xf32, #tpu.memory_space<vmem>>, %arg11: memref<16x128xf32, #tpu.memory_space<vmem>>) attributes {dimension_semantics = [#tpu.dimension_semantics<parallel>, #tpu.dimension_semantics<parallel>, #tpu.dimension_semantics<arbitrary>], iteration_bounds = array<i64: 2, 2, 2>, scalar_prefetch = 0 : i64, scratch_operands = 3 : i64, tpu.core_type = #tpu.core_type<tc>, window_params = [{transform_indices = @transform_0, window_bounds = array<i64: 1, 16, 128>}, {transform_indices = @transform_1, window_bounds = array<i64: 1, 16, 128>}, {transform_indices = @transform_2, window_bounds = array<i64: 1, 16, 128>}, {transform_indices = @transform_3, window_bounds = array<i64: 1, 16, 128>}, {transform_indices = @transform_4, window_bounds = array<i64: 1, 1>}, {transform_indices = @transform_5, window_bounds = array<i64: 1, 16, 128>}]} {
    %c0_i32 = arith.constant 0 : i32
    %0 = arith.cmpi eq, %arg2, %c0_i32 : i32
    %1 = arith.extui %0 : i1 to i32
    %c0_i32_0 = arith.constant 0 : i32
    %2 = arith.cmpi ne, %1, %c0_i32_0 : i32
    scf.if %2 {
      %cst_27 = arith.constant 0xFF800000 : f32
      %38 = vector.broadcast %cst_27 : f32 to vector<1x128xf32>
      %c0_28 = arith.constant 0 : index
      %c0_29 = arith.constant 0 : index
      %39 = vector.load %arg9[%c0_28, %c0_29] : memref<1x128xf32, #tpu.memory_space<vmem>>, vector<1x128xf32>
      tpu.vector_store %arg9[%c0_28, %c0_29], %38 {strides = array<i32>} : memref<1x128xf32, #tpu.memory_space<vmem>>, vector<1x128xf32>,
      %cst_30 = arith.constant 0.000000e+00 : f32
      %40 = vector.broadcast %cst_30 : f32 to vector<1x128xf32>
      %c0_31 = arith.constant 0 : index
      %c0_32 = arith.constant 0 : index
      %41 = vector.load %arg10[%c0_31, %c0_32] : memref<1x128xf32, #tpu.memory_space<vmem>>, vector<1x128xf32>
      tpu.vector_store %arg10[%c0_31, %c0_32], %40 {strides = array<i32>} : memref<1x128xf32, #tpu.memory_space<vmem>>, vector<1x128xf32>,
      %cst_33 = arith.constant 0.000000e+00 : f32
      %42 = vector.broadcast %cst_33 : f32 to vector<16x128xf32>
      %c0_34 = arith.constant 0 : index
      %c0_35 = arith.constant 0 : index
      %43 = vector.load %arg11[%c0_34, %c0_35] : memref<16x128xf32, #tpu.memory_space<vmem>>, vector<16x128xf32>
      tpu.vector_store %arg11[%c0_34, %c0_35], %42 {strides = array<i32>} : memref<16x128xf32, #tpu.memory_space<vmem>>, vector<16x128xf32>,
    } else {
    }
    %c0 = arith.constant 0 : index
    %c0_1 = arith.constant 0 : index
    %c0_2 = arith.constant 0 : index
    %3 = vector.load %arg3[%c0, %c0_1, %c0_2] : memref<1x16x128xbf16, #tpu.memory_space<vmem>>, vector<1x16x128xbf16>
    %4 = vector.shape_cast %3 : vector<1x16x128xbf16> to vector<16x128xbf16>
    %c0_3 = arith.constant 0 : index
    %c0_4 = arith.constant 0 : index
    %c0_5 = arith.constant 0 : index
    %5 = vector.load %arg4[%c0_3, %c0_4, %c0_5] : memref<1x16x128xbf16, #tpu.memory_space<vmem>>, vector<1x16x128xbf16>
    %6 = vector.shape_cast %5 : vector<1x16x128xbf16> to vector<16x128xbf16>
    %c0_6 = arith.constant 0 : index
    %c0_7 = arith.constant 0 : index
    %c0_8 = arith.constant 0 : index
    %7 = vector.load %arg5[%c0_6, %c0_7, %c0_8] : memref<1x16x128xbf16, #tpu.memory_space<vmem>>, vector<1x16x128xbf16>
    %8 = vector.shape_cast %7 : vector<1x16x128xbf16> to vector<16x128xbf16>
    %cst = arith.constant dense<0.000000e+00> : vector<128x128xf32>
    %9 = tpu.matmul %6, %4, %cst {dimension_numbers = #tpu.dot_dimension_numbers<[0], [0], [1], [1], [0, 1, 1, 1], [], []>} : vector<16x128xbf16>, vector<16x128xbf16>, vector<128x128xf32> -> vector<128x128xf32>
    %c0_9 = arith.constant 0 : index
    %c0_10 = arith.constant 0 : index
    %10 = vector.load %arg9[%c0_9, %c0_10] : memref<1x128xf32, #tpu.memory_space<vmem>>, vector<1x128xf32>
    %cst_11 = arith.constant dense<0xFF800000> : vector<128xf32>
    %11 = vector.multi_reduction <maximumf>, %9, %cst_11 [0] : vector<128x128xf32> to vector<128xf32>
    %12 = vector.shape_cast %11 : vector<128xf32> to vector<1x128xf32>
    %13 = arith.maximumf %10, %12 : vector<1x128xf32>
    %c0_12 = arith.constant 0 : index
    %c0_13 = arith.constant 0 : index
    %14 = vector.load %arg9[%c0_12, %c0_13] : memref<1x128xf32, #tpu.memory_space<vmem>>, vector<1x128xf32>
    %15 = arith.subf %14, %13 : vector<1x128xf32>
    %16 = math.exp %15 : vector<1x128xf32>
    %17 = vector.broadcast %13 : vector<1x128xf32> to vector<128x128xf32>
    %18 = arith.subf %9, %17 : vector<128x128xf32>
    %19 = arith.truncf %18 : vector<128x128xf32> to vector<128x128xbf16>
    %20 = math.exp %19 : vector<128x128xbf16>
    %c0_14 = arith.constant 0 : index
    %c0_15 = arith.constant 0 : index
    %21 = vector.load %arg10[%c0_14, %c0_15] : memref<1x128xf32, #tpu.memory_space<vmem>>, vector<1x128xf32>
    %22 = arith.mulf %16, %21 : vector<1x128xf32>
    %23 = arith.extf %20 : vector<128x128xbf16> to vector<128x128xf32>
    %cst_16 = arith.constant dense<0.000000e+00> : vector<128xf32>
    %24 = vector.multi_reduction <add>, %23, %cst_16 [0] : vector<128x128xf32> to vector<128xf32>
    %25 = vector.shape_cast %24 : vector<128xf32> to vector<1x128xf32>
    %26 = arith.addf %22, %25 : vector<1x128xf32>
    %c0_17 = arith.constant 0 : index
    %c0_18 = arith.constant 0 : index
    %27 = vector.load %arg10[%c0_17, %c0_18] : memref<1x128xf32, #tpu.memory_space<vmem>>, vector<1x128xf32>
    tpu.vector_store %arg10[%c0_17, %c0_18], %26 {strides = array<i32>} : memref<1x128xf32, #tpu.memory_space<vmem>>, vector<1x128xf32>,
    %cst_19 = arith.constant dense<0.000000e+00> : vector<16x128xf32>
    %28 = tpu.matmul %8, %20, %cst_19 {dimension_numbers = #tpu.dot_dimension_numbers<[1], [0], [0], [1], [0, 0, 1, 1], [], []>} : vector<16x128xbf16>, vector<128x128xbf16>, vector<16x128xf32> -> vector<16x128xf32>
    %c0_20 = arith.constant 0 : index
    %c0_21 = arith.constant 0 : index
    %29 = vector.load %arg11[%c0_20, %c0_21] : memref<16x128xf32, #tpu.memory_space<vmem>>, vector<16x128xf32>
    %30 = vector.broadcast %16 : vector<1x128xf32> to vector<16x128xf32>
    %31 = arith.mulf %30, %29 : vector<16x128xf32>
    %32 = arith.addf %31, %28 : vector<16x128xf32>
    %c0_22 = arith.constant 0 : index
    %c0_23 = arith.constant 0 : index
    %33 = vector.load %arg11[%c0_22, %c0_23] : memref<16x128xf32, #tpu.memory_space<vmem>>, vector<16x128xf32>
    tpu.vector_store %arg11[%c0_22, %c0_23], %32 {strides = array<i32>} : memref<16x128xf32, #tpu.memory_space<vmem>>, vector<16x128xf32>,
    %c0_24 = arith.constant 0 : index
    %c0_25 = arith.constant 0 : index
    %34 = vector.load %arg9[%c0_24, %c0_25] : memref<1x128xf32, #tpu.memory_space<vmem>>, vector<1x128xf32>
    tpu.vector_store %arg9[%c0_24, %c0_25], %13 {strides = array<i32>} : memref<1x128xf32, #tpu.memory_space<vmem>>, vector<1x128xf32>,
    %c1_i32 = arith.constant 1 : i32
    %35 = arith.cmpi eq, %arg2, %c1_i32 : i32
    %36 = arith.extui %35 : i1 to i32
    %c0_i32_26 = arith.constant 0 : i32
    %37 = arith.cmpi ne, %36, %c0_i32_26 : i32
    scf.if %37 {
      %c0_27 = arith.constant 0 : index
      %c0_28 = arith.constant 0 : index
      %38 = memref.load %arg7[%c0_27, %c0_28] : memref<1x1xf32, #tpu.memory_space<smem>>
      %c0_29 = arith.constant 0 : index
      %c0_30 = arith.constant 0 : index
      %39 = vector.load %arg10[%c0_29, %c0_30] : memref<1x128xf32, #tpu.memory_space<vmem>>, vector<1x128xf32>
      %40 = tpu.reciprocal %39 {approx = true} : vector<1x128xf32> -> vector<1x128xf32>
      %c0_31 = arith.constant 0 : index
      %c0_32 = arith.constant 0 : index
      %41 = vector.load %arg11[%c0_31, %c0_32] : memref<16x128xf32, #tpu.memory_space<vmem>>, vector<16x128xf32>
      %42 = vector.broadcast %40 : vector<1x128xf32> to vector<16x128xf32>
      %43 = arith.mulf %41, %42 : vector<16x128xf32>
      %44 = vector.broadcast %38 : f32 to vector<16x128xf32>
      %45 = arith.mulf %44, %43 : vector<16x128xf32>
      %c0_33 = arith.constant 0 : index
      %c0_34 = arith.constant 0 : index
      %c0_35 = arith.constant 0 : index
      %46 = vector.load %arg6[%c0_33, %c0_34, %c0_35] : memref<1x16x128xf32, #tpu.memory_space<vmem>>, vector<1x16x128xf32>
      %47 = vector.shape_cast %46 : vector<1x16x128xf32> to vector<16x128xf32>
      %48 = arith.addf %45, %47 : vector<16x128xf32>
      %c0_36 = arith.constant 0 : index
      %c0_37 = arith.constant 0 : index
      %c0_38 = arith.constant 0 : index
      %49 = vector.load %arg8[%c0_36, %c0_37, %c0_38] : memref<1x16x128xf32, #tpu.memory_space<vmem>>, vector<1x16x128xf32>
      %50 = vector.shape_cast %49 : vector<1x16x128xf32> to vector<16x128xf32>
      %51 = vector.shape_cast %48 : vector<16x128xf32> to vector<1x16x128xf32>
      tpu.vector_store %arg8[%c0_36, %c0_37, %c0_38], %51 {strides = array<i32>} : memref<1x16x128xf32, #tpu.memory_space<vmem>>, vector<1x16x128xf32>,
    } else {
    }
    return
  }
  func.func @transform_0(%arg0: i32, %arg1: i32, %arg2: i32) -> (i32, i32, i32) {
    %c0_i32 = arith.constant 0 : i32
    %c0_i32_0 = arith.constant 0 : i32
    return %arg0, %c0_i32, %arg1 : i32, i32, i32
  }
  func.func @transform_1(%arg0: i32, %arg1: i32, %arg2: i32) -> (i32, i32, i32) {
    %c0_i32 = arith.constant 0 : i32
    %c0_i32_0 = arith.constant 0 : i32
    return %arg0, %c0_i32, %arg2 : i32, i32, i32
  }
  func.func @transform_2(%arg0: i32, %arg1: i32, %arg2: i32) -> (i32, i32, i32) {
    %c0_i32 = arith.constant 0 : i32
    %c0_i32_0 = arith.constant 0 : i32
    return %arg0, %c0_i32, %arg2 : i32, i32, i32
  }
  func.func @transform_3(%arg0: i32, %arg1: i32, %arg2: i32) -> (i32, i32, i32) {
    %c0_i32 = arith.constant 0 : i32
    %c0_i32_0 = arith.constant 0 : i32
    return %arg0, %c0_i32, %arg1 : i32, i32, i32
  }
  func.func @transform_4(%arg0: i32, %arg1: i32, %arg2: i32) -> (i32, i32) {
    %c0_i32 = arith.constant 0 : i32
    %c0_i32_0 = arith.constant 0 : i32
    %c0_i32_1 = arith.constant 0 : i32
    return %c0_i32, %c0_i32_0 : i32, i32
  }
  func.func @transform_5(%arg0: i32, %arg1: i32, %arg2: i32) -> (i32, i32, i32) {
    %c0_i32 = arith.constant 0 : i32
    %c0_i32_0 = arith.constant 0 : i32
    return %arg0, %c0_i32, %arg1 : i32, i32, i32
  }
}

</mosaic_0001>

<bundles_post_ra>
// kernel: tpu_custom_call.1
= control target key start
LH: loop header
LB: loop body
LE: loop exit
PB: predicated region body
PF: predicated region fallthrough
CT: control target
= control target key end

     0   :  { %s1780_s0 = inlined_call_operand.hbm [shape: bf16[2,16,256], index: 0, kind: input, shape index: {}]   ;;  %s1781_s1 = inlined_call_operand.hbm [shape: bf16[2,16,256], index: 1, kind: input, shape index: {}]   ;;  %s1782_s2 = inlined_call_operand.hbm [shape: bf16[2,16,256], index: 2, kind: input, shape index: {}]   ;;  %s1783_s3 = inlined_call_operand.hbm [shape: f32[2,16,256], index: 3, kind: input, shape index: {}]   ;;  %s1784_s4 = inlined_call_operand.<no memory space> [shape: f32[1,1], index: 4, kind: input, shape index: {}]   ;;  %s1785_s5 = inlined_call_operand.hbm [shape: f32[2,16,256], index: 5, kind: output, shape index: {}]  }
   0x1   :  { %1807 = sst [smem:[#allocation33_spill]] %s1780_s0 }
   0x2   :  { %1808 = sst [smem:[#allocation34_spill]] %s1781_s1 }
   0x3   :  { %1809 = sst [smem:[#allocation35_spill]] %s1782_s2 }
   0x4   :  { %1810 = sst [smem:[#allocation36_spill]] %s1783_s3 }
   0x5   :  { %1811 = sst [smem:[#allocation37_spill]] %s1785_s5 }
   0x6   :  { %10 = sst [smem:[#allocation5]] %s1784_s4 }
   0x7   :  { %11 = vsyncpa [#allocation7], 0 }
   0x8   :  { %12 = vsyncpa [#allocation10], 0 }
   0x9   :  { %14 = vsyncpa [#allocation10 + $0x1], 0 }
   0xa   :  { %15 = vsyncpa [#allocation13], 0 }
   0xb   :  { %16 = vsyncpa [#allocation8], 0 }
   0xc   :  { %18 = vsyncpa [#allocation8 + $0x1], 0  ;;  %s1399_s20 = smov 0   ;;  %s1401_s21 = smov 0  }
   0xd   :  { %s1403_s22 = smov 0   ;;  %s1405_s23 = smov 0  }
   0xe   :  { %s1407_s24 = smov 0   ;;  %s1409_s25 = smov 0  }
   0xf   :  { %s1411_s26 = smov 0   ;;  %s1413_s4 = smov 0  }
  0x10   :  { %s1415_s27 = smov 0   ;;  %s1417_s28 = smov 0  }
  0x11   :  { %s1419_s29 = smov 0   ;;  %s1421_s30 = smov 0  }
  0x12   :  { %s1423_s6 = smov 0  }
  0x13 LB: > { %1812 = sst [smem:[#allocation19_spill]] %s1312_s22  ;;  %s36_s7 = sadd.s32 1, %s1340_s28  ;;  %s1352_s6 = sphi %s1423_s6, %s24_s6   ;;  %s1348_s30 = sphi %s1421_s30, %s1866_s30   ;;  %s1344_s29 = sphi %s1419_s29, %s1865_s29   ;;  %s1340_s28 = sphi %s1417_s28, %s1864_s28   ;;  %s1336_s27 = sphi %s1415_s27, %s1863_s27   ;;  %s1332_s4 = sphi %s1413_s4, %s1862_s4   ;;  %s1328_s26 = sphi %s1411_s26, %s1861_s26   ;;  %s1324_s25 = sphi %s1409_s25, %s1860_s25   ;;  %s1320_s24 = sphi %s1407_s24, %s1870_s24   ;;  %s1316_s23 = sphi %s1405_s23, %s1869_s23   ;;  %s1312_s22 = sphi %s1403_s22, %s1858_s22   ;;  %s1308_s21 = sphi %s1401_s21, %s1868_s21   ;;  %s1304_s20 = sphi %s1399_s20, %s1867_s20  }
  0x14   : > { %1813 = sst [smem:[#allocation20_spill]] %s1316_s23  ;;  %s39_s8 = sadd.s32 1, %s1344_s29 }
  0x15   : > { %1814 = sst [smem:[#allocation21_spill]] %s1324_s25  ;;  %p37_p0 = scmp.ge.s32.totalorder %s36_s7, 2 }
  0x16   : > { %1815 = sst [smem:[#allocation22_spill]] %s1328_s26  ;;  %s43_s9 = sadd.s32 1, %s1348_s30 }
  0x17   : > { %1816 = sst [smem:[#allocation23_spill]] %s1332_s4  ;;  %s52_s10 = sadd.s32 1, %s1324_s25 }
  0x18   : > { %1817 = sst [smem:[#allocation24_spill]] %s1336_s27  ;;  %s80_s11 = sadd.s32 1, %s1312_s22 }
  0x19   : > { %1818 = sst [smem:[#allocation25_spill]] %s1340_s28  ;;  %s1872_s7 = smov (%p37_p0, %s36_s7), 0 }
  0x1a   : > { %1819 = sst [smem:[#allocation26_spill]] %s1344_s29  ;;  %s1874_s8 = smov (!%p37_p0, %s39_s8), %s1344_s29 }
  0x1b   : > { %1820 = sst [smem:[#allocation27_spill]] %s1348_s30  ;;  %s76_s12 = ssub.s32 %s1340_s28, %s1872_s7 }
  0x1c   : > { %1821 = sst [smem:[#allocation28_spill]] %s1872_s7  ;;  %p87_p1 = scmp.ne.s32.totalorder %s1312_s22, %s1308_s21 }
  0x1d   : > { %p41_p2 = scmp.ge.s32.totalorder %s1874_s8, 2  ;;  %p88_p3 = scmp.eq.s32.totalorder %s1352_s6, 0 }
  0x1e   : > { %p93_p4 = scmp.ne.s32.totalorder %s1308_s21, %s1304_s20  ;;  %p931_p7 = scmp.lt.s32.totalorder %s1352_s6, 8 }
  0x1f   : > { %s1876_s8 = smov (%p41_p2, %s1874_s8), 0  ;;  %s1878_s9 = smov (!%p41_p2, %s43_s9), %s1348_s30 }
  0x20   : > { %1822 = sst [smem:[#allocation29_spill]] %s1876_s8  ;;  %s48_s13 = ssub.s32 %s1344_s29, %s1876_s8 }
  0x21   : > { %p1484_p5 = por %p88_p3, %p87_p1  ;;  %p45_p6 = scmp.ge.s32.totalorder %s1878_s9, 2 }
  0x22   : > { %s261_s15 = sand.u32 1, %s1352_s6   ;;  %s263_s19 = sand.u32 1, %s1312_s22  }
  0x23   : > { %s1880_s9 = smov (%p45_p6, %s1878_s9), 0  ;;  %s862_s8 = sshll.u32 %s1348_s30, 2 }
  0x24   : > { %1824 = sst [smem:[#allocation30_spill]] %s1880_s9  ;;  %s47_s16 = ssub.s32 %s1348_s30, %s1880_s9 }
  0x25   : > { %s49_s17 = sor.u32 %s48_s13, %s47_s16  ;;  %s77_s18 = sor.u32 %s76_s12, %s47_s16 }
  0x26   : > { %p50_p8 = scmp.eq.s32.totalorder %s49_s17, 0  ;;  %p78_p9 = scmp.eq.s32.totalorder %s77_s18, 0 }
  0x27   : > { %s861_s5 = sshll.u32 %s263_s19, 3  ;;  %s269_s26 = sadd.s32 %s1340_s28, %s862_s8 }
  0x28   : > { %s1497_s7 = scalar_select %p50_p8, %s1324_s25, %s52_s10  }
  0x29   : > { %s1500_s29 = scalar_select %p78_p9, %s1312_s22, %s80_s11  }
  0x2a   : > { %1825 = sst [smem:[#allocation31_spill]] %s1497_s7  ;;  %s863_s3 = sshll.u32 %s269_s26, 2 }
  0x2b   : > { %1826 = sst [smem:[#allocation32_spill]] %s1500_s29  ;;  %s265_s9 = scalar_lea.vmem [#allocation9], %s861_s5 }
  0x2c   : > { %s1827_s1 = sld [smem:[#allocation34_spill]]  ;;  %s274_s13 = sshll.u32 %s265_s9, 4  ;;  %s275_s13 = int_to_ptr.vmem [resolvable:$true] %s274_s13 }
  0x2d   : > { %p1510_p10 = pnand %p931_p7, %p1484_p5  ;;  %s1829_s2 = sld [smem:[#allocation35_spill]] }
  0x2e   : > { %s1794_s9 = smov 128   ;;  %s1796_s11 = smov 64  }
  0x2f   : > { %s1798_s14 = smov 4   ;;  %s288_s16 = scalar_lea.vmem [#allocation11], %s861_s5 }
  0x30   : > { %s1527_s17 = sshll.u32 %s288_s16, 4  ;;  %s1531_s18 = sadd.s32 4294967295, %s1352_s6  }
  0x31   : > { %s854_s19 = sadd.s32 4294967294, %s1352_s6   ;;  %p65_p11 = scmp.ne.s32.totalorder %s1320_s24, %s1316_s23 }
  0x32   : > { %s271_s27 = scalar_lea.hbm %s1827_s1, %s863_s3  ;;  %p66_p12 = scmp.eq.s32.totalorder %s1531_s18, 0 }
  0x33   : > { %s272_s12 = sshll.u32 %s271_s27, 4  ;;  %s294_s0 = scalar_lea.hbm %s1829_s2, %s863_s3  ;;  %s273_s12 = int_to_ptr.hbm [resolvable:$true] %s272_s12 }
  0x34   : > { %s295_s4 = sshll.u32 %s294_s0, 4  ;;  %s1517_s27 = scalar_lea.sflag [#allocation10], %s261_s15  ;;  %s1525_s4 = int_to_ptr.hbm [resolvable:$true] %s295_s4 }
  0x35   : > { %923 = dma.hbm_to_vmem [thread:$0]  (!%p1510_p10), %s273_s12, 128, %s275_s13, %s1517_s27, %s1794_s9, %s1796_s11, %s1798_s14  }
  0x36   : > { %s1830_s3 = sld [smem:[#allocation24_spill]]  ;;  %p195_p13 = scmp.ne.s32.totalorder %s1324_s25, %s1320_s24 }
  0x37   : > { %1831 = sst [smem:[#allocation24_spill]] %s1527_s17  ;;  %p196_p0 = scmp.eq.s32.totalorder %s1531_s18, 7 }
  0x38   : > { %s1832_s15 = sld [smem:[#allocation23_spill]]  ;;  %p202_p1 = scmp.eq.s32.totalorder %s854_s19, 7 }
  0x39   : > { %p1540_p2 = por %p66_p12, %p65_p11  ;;  %p1547_p3 = por %p93_p4, %p66_p12 }
  0x3a   : > { %p1551_p5 = por %p196_p0, %p195_p13  ;;  %p1555_p6 = por %p202_p1, %p65_p11 }
  0x3b   : > { %p855_p7 = scmp.ge.s32.totalorder %s1352_s6, 1  ;;  %p209_p8 = scmp.lt.s32.totalorder %s1352_s6, 9 }
  0x3c   : > { %s1836_s26 = scalar_select %p1555_p6, 1, 0 }
  0x3d   : > { %s856_s8 = sshll.u32 %s1830_s3, 2  ;;  %p1562_p9 = pnand %p855_p7, %p209_p8 }
  0x3e   : > { %1837 = sst [smem:[#allocation23_spill]] %s1836_s26  ;;  %s1567_s20 = sadd.s32 %s1832_s15, %s856_s8 }
  0x3f   : > { %s857_s16 = sshll.u32 %s1567_s20, 2  ;;  %s1357_s19 = smov [#allocation6]  }
  0x40   : > { %s226_s17 = sshll.u32 %s1357_s19, 4  ;;  %p913_p4 = pneg %p1562_p9  ;;  %s227_s17 = int_to_ptr.vmem [resolvable:$true] %s226_s17 }
  0x41   : > { %s1839_s14 = sld [smem:[#allocation33_spill]]  ;;  %s1804_s15 = sshll.u32 %s1567_s20, 3 }
  0x42   : > { %p1577_p11 = pnand %p913_p4, %p1540_p2  ;;  %s1841_s30 = sld [smem:[#allocation36_spill]] }
  0x44   : > { %p1120_p13 = pneg %p1577_p11 }
  0x47   : > { %s223_s1 = scalar_lea.hbm %s1839_s14, %s857_s16  ;;  %s1123_s16 = scalar_lea.hbm %s1839_s14, 32 }
  0x48   : > { %s224_s3 = sshll.u32 %s223_s1, 4  ;;  %s1842_s7 = smov %s1841_s30  ;;  %s225_s3 = int_to_ptr.hbm [resolvable:$true] %s224_s3 }
  0x49   : > { %s241_s28 = scalar_lea.hbm %s1841_s30, %s1804_s15  ;;  %s1116_s25 = sshra.s32 %s225_s3, 4  ;;  %s1117_s25 = int_to_ptr.hbm [resolvable:$true] %s1116_s25 }
  0x4a   : > { %s1118_s9 = scalar_lea.hbm %s1117_s25, 8  ;;  %p1124_p7 = scmp.lt.s32.totalorder %s1117_s25, %s1839_s14 }
  0x4b   : > { %p1119_p12 = scmp.ne.s32.totalorder %s1117_s25, %s1118_s9  ;;  %p1125_p8 = scmp.lt.s32.totalorder %s1123_s16, %s1118_s9 }
  0x4d   : > { %p1121_p0 = pnand %p1120_p13, %p1119_p12  ;;  %p1126_p4 = por %p1125_p8, %p1124_p7 }
  0x4f   : > { %p1122_p1 = pneg %p1121_p0 }
  0x51   : > { %p1127_p6 = pnand %p1126_p4, %p1122_p1 }
  0x53   : > { %1130 = shalt.err (!%p1127_p6)
}
  0x54   : > { %s1843_s30 = smov 4   ;;  %s1844_s8 = smov 64  }
  0x55   : > { %s1845_s19 = smov 128   ;;  %s242_s15 = sshll.u32 %s241_s28, 4  ;;  %s243_s15 = int_to_ptr.hbm [resolvable:$true] %s242_s15 }
  0x56   : > { %916 = dma.hbm_to_vmem [thread:$0]  (!%p1577_p11), %s225_s3, 128, %s227_s17, [#allocation7], %s1845_s19, %s1844_s8, %s1843_s30  }
  0x57   : > { %s1358_s26 = smov [#allocation12]   ;;  %s1146_s1 = sshra.s32 %s243_s15, 4  ;;  %s1147_s1 = int_to_ptr.hbm [resolvable:$true] %s1146_s1 }
  0x58   : > { %s244_s23 = sshll.u32 %s1358_s26, 4  ;;  %s1148_s22 = scalar_lea.hbm %s1147_s1, 16  ;;  %s245_s23 = int_to_ptr.vmem [resolvable:$true] %s244_s23 }
  0x59   : > { %p1149_p12 = scmp.ne.s32.totalorder %s1147_s1, %s1148_s22  ;;  %s1153_s9 = scalar_lea.hbm %s1842_s7, 64 }
  0x5a   : > { %p1154_p1 = scmp.lt.s32.totalorder %s1147_s1, %s1842_s7  ;;  %p1155_p7 = scmp.lt.s32.totalorder %s1153_s9, %s1148_s22 }
  0x5b   : > { %p1151_p0 = pnand %p1149_p12, %p1120_p13 }
  0x5c   : > { %p1156_p8 = por %p1155_p7, %p1154_p1 }
  0x5d   : > { %p1152_p6 = pneg %p1151_p0 }
  0x5f   : > { %p1157_p4 = pnand %p1156_p8, %p1152_p6 }
  0x61   : > { %1160 = shalt.err (!%p1157_p4)
}
  0x62   : > { %s1359_s28 = smov 256   ;;  %s1846_s17 = sld [smem:[#allocation24_spill]] }
  0x63   : > { %s1360_s26 = smov 8  }
  0x64   : > { %919 = dma.hbm_to_vmem [thread:$0]  (!%p1577_p11), %s243_s15, 256, %s245_s23, [#allocation13], %s1359_s28, %s1845_s19, %s1360_s26  }
  0x65   : > { %309 = sbr.rel (%p1562_p9) target bundleno = 805 (0x325), region = 40 }
  0x68   : > { %s1847_s3 = int_to_ptr.vmem [resolvable:$true] %s1846_s17 }
  0x69   : > { %926 = dma.hbm_to_vmem [thread:$0]  (!%p1510_p10), %s1525_s4, 128, %s1847_s3, %s1517_s27, %s1845_s19, %s1844_s8, %s1843_s30  }
  0x6a   : > { %1287 = dma.done.wait (%p1540_p2), [#allocation7], 128  }
  0x6b   : > { %1289 = vsyncadd (%p1540_p2), [#allocation7], 4294967168  ;;  %s316_s2 = sand.u32 1, %s1531_s18   ;;  %s318_s23 = sand.u32 1, %s1308_s21  }
  0x6c   : > { %s1632_s10 = sshll.u32 %s318_s23, 3  ;;  %s317_s15 = scalar_lea.sflag [#allocation10], %s316_s2 }
  0x6d   : > { %s320_s1 = scalar_lea.vmem [#allocation9], %s1632_s10 }
  0x6e   : > { %1291 = dma.done.wait (%p1547_p3), %s317_s15, 256  }
  0x6f   : > { %1293 = vsyncadd (%p1547_p3), %s317_s15, 4294967040  ;;  %s330_s4 = scalar_lea.vmem [#allocation11], %s1632_s10 }
  0x70   : > { %1295 = dma.done.wait (%p1540_p2), [#allocation13], 256  }
  0x71   : > { %1297 = vsyncadd (%p1540_p2), [#allocation13], 4294967040  ;;  %s365_s27 = sand.u32 1, %s1320_s24   ;;  %s1848_s30 = sld [smem:[#allocation22_spill]] }
  0x72   : > { %s870_s18 = sshll.u32 %s365_s27, 4 }
  0x73   : > { %s1647_s0 = scalar_lea.vmem [#allocation14], %s870_s18 }
  0x77   : > { %p871_p10 = scmp.ne.s32.totalorder %s1848_s30, 0 }
  0x79   : > { %372 = sbr.rel (%p871_p10) target bundleno = 131 (0x83), region = 60 }
  0x7e   : > { %v1361_v0 = vmov -inf   ;;  %v1362_v1 = vmov 0.0  }
  0x7f   : > { %373 = vst [vmem:[#allocation2] sm:$0x1] %v1361_v0 }
  0x80   : > { %374 = vst [vmem:[#allocation3] sm:$0x1] %v1362_v1 }
  0x81   : > { %375 = vst [vmem:[#allocation4] sm:$0xff] %v1362_v1 }
  0x82   : > { %376 = vst [vmem:[#allocation4 + $0x8] sm:$0xff] %v1362_v1 }
  0x83 PF: > { %v899_v2 = vld [vmem:[%s320_s1] sm:$0xff]  ;;  %v898_v3 = vld [vmem:[#allocation6] sm:$0xff]  ;;  %vm411_vm0 = vcmask 130048   ;;  %s1849_s13 = sld [smem:[#allocation22_spill]] }
  0x84   : > { %389 = vxpose.xlu0.c.b16.start.end [1/1] (short) %v899_v2, 128  ;;  %443 = vmatpush.bf16.msra.mxu0 %v898_v3 }
  0x85   : > { %901 = vmatpush.bf16.msra.mxu2 %v898_v3  ;;  %902 = vmatpush.bf16.msra.mxu3 %v898_v3 }
  0x86   : > { %v1679_v48 = vld [vmem:[#allocation2] sm:$0x1] }
  0x89   : > { %p892_p2 = scmp.ne.s32.totalorder %s1849_s13, 1 }
  0x8a   : > { %s671_s5 = sld [smem:[#allocation5]] (!%p892_p2) }
 0x130   : > { %v397_v4 = vpop.trf.xlu0 }
 0x131   : > { %880 = vmatmul.msk.bf16.vlgmr.msra.gmra.mxu0 %vm411_vm0, %v397_v4 }
 0x140   : > { %v398_v5 = vpop.trf.xlu0 }
 0x141   : > { %881 = vmatmul.msk.bf16.gmra.mxu0 %vm411_vm0, %v398_v5 }
 0x150   : > { %v399_v6 = vpop.trf.xlu0 }
 0x151   : > { %882 = vmatmul.msk.bf16.gmra.mxu0 %vm411_vm0, %v399_v6 }
 0x160   : > { %v400_v7 = vpop.trf.xlu0 }
 0x161   : > { %883 = vmatmul.msk.bf16.vlgmr.msra.gmra.mxu2 %vm411_vm0, %v400_v7 }
 0x170   : > { %v401_v8 = vpop.trf.xlu0 }
 0x171   : > { %884 = vmatmul.msk.bf16.gmra.mxu2 %vm411_vm0, %v401_v8 }
 0x180   : > { %v402_v9 = vpop.trf.xlu0 }
 0x181   : > { %885 = vmatmul.msk.bf16.gmra.mxu2 %vm411_vm0, %v402_v9 }
 0x190   : > { %v403_v10 = vpop.trf.xlu0 }
 0x191   : > { %886 = vmatmul.msk.bf16.vlgmr.msra.gmra.mxu3 %vm411_vm0, %v403_v10 }
 0x1a0   : > { %v404_v11 = vpop.trf.xlu0 }
 0x1a1   : > { %887 = vmatmul.msk.bf16.gmra.mxu3 %vm411_vm0, %v404_v11 }
 0x1ae   : > { %v1658_v12 = vpop.f32.mrf.mxu0 }
 0x1b6   : > { %v1662_v14 = vpop.f32.mrf.mxu0 }
 0x1be   : > { %v1664_v16 = vpop.f32.mrf.mxu0 }
 0x1c6   : > { %v1666_v18 = vpop.f32.mrf.mxu0 }
 0x1ce   : > { %v1668_v21 = vpop.f32.mrf.mxu0 }
 0x1cf   : > { %v486_v28 = vmax.f32 %v1658_v12, %v1668_v21 }
 0x1d6   : > { %v1670_v24 = vpop.f32.mrf.mxu0 }
 0x1d7   : > { %v487_v26 = vmax.f32 %v1662_v14, %v1670_v24 }
 0x1e4   : > { %v1660_v13 = vpop.f32.mrf.mxu2 }
 0x1e5   : > { %v488_v29 = vmax.f32 %v1664_v16, %v1660_v13 }
 0x1ec   : > { %v462_v15 = vpop.f32.mrf.mxu2 }
 0x1ed   : > { %v489_v30 = vmax.f32 %v1666_v18, %v462_v15 }
 0x1f4   : > { %v465_v17 = vpop.f32.mrf.mxu2 }
 0x1f5   : > { %v490_v32 = vmax.f32 %v486_v28, %v465_v17 }
 0x1fc   : > { %v467_v19 = vpop.f32.mrf.mxu2 }
 0x1fd   : > { %v491_v31 = vmax.f32 %v487_v26, %v467_v19 }
 0x204   : > { %v470_v23 = vpop.f32.mrf.mxu2 }
 0x205   : > { %v492_v33 = vmax.f32 %v488_v29, %v470_v23 }
 0x20c   : > { %v472_v27 = vpop.f32.mrf.mxu2 }
 0x20d   : > { %v493_v34 = vmax.f32 %v489_v30, %v472_v27 }
 0x214   : > { %v475_v20 = vpop.f32.mrf.mxu3 }
 0x215   : > { %v494_v37 = vmax.f32 %v490_v32, %v475_v20 }
 0x21c   : > { %v477_v22 = vpop.f32.mrf.mxu3 }
 0x21d   : > { %v495_v35 = vmax.f32 %v491_v31, %v477_v22 }
 0x21f   : > { %v498_v40 = vmax.f32 %v494_v37, %v495_v35 }
 0x224   : > { %v480_v25 = vpop.f32.mrf.mxu3 }
 0x225   : > { %v496_v38 = vmax.f32 %v492_v33, %v480_v25 }
 0x22c   : > { %v482_v36 = vpop.f32.mrf.mxu3 }
 0x22d   : > { %v497_v39 = vmax.f32 %v493_v34, %v482_v36 }
 0x22f   : > { %v499_v41 = vmax.f32 %v496_v38, %v497_v39 }
 0x231   : > { %v500_v42 = vmax.f32 %v498_v40, %v499_v41 }
 0x233   : > { %v501_v43 = vrot.slane %v500_v42, 4 }
 0x235   : > { %v502_v44 = vmax.f32 %v500_v42, %v501_v43 }
 0x237   : > { %v503_v45 = vrot.slane %v502_v44, 2 }
 0x239   : > { %v504_v46 = vmax.f32 %v502_v44, %v503_v45 }
 0x23b   : > { %v505_v47 = vrot.slane %v504_v46, 1 }
 0x23d   : > { %v506_v49 = vmax.f32 %v504_v46, %v505_v47 }
 0x23f   : > { %v1682_v50 = vmax.f32 %v1679_v48, %v506_v49 }
 0x241   : > { %v512_v51 = vperm.slane %v1682_v50, 0  ;;  %666 = vst [vmem:[#allocation2] sm:$0x1] %v1682_v50  ;;  %v508_v52 = vsub.f32 %v1679_v48, %v1682_v50  ;;  %v656_v48 = vld [vmem:[#allocation4 + $0x8] sm:$0xff] }
 0x243   : > { %v528_v53 = vsub.f32 %v480_v25, %v512_v51  ;;  %v529_v54 = vsub.f32 %v482_v36, %v512_v51  ;;  %v526_v55 = vsub.f32 %v475_v20, %v512_v51  ;;  %v527_v56 = vsub.f32 %v477_v22, %v512_v51 }
 0x244   : > { %v524_v57 = vsub.f32 %v470_v23, %v512_v51  ;;  %v525_v58 = vsub.f32 %v472_v27, %v512_v51  ;;  %v522_v59 = vsub.f32 %v465_v17, %v512_v51  ;;  %v523_v60 = vsub.f32 %v467_v19, %v512_v51 }
 0x245   : > { %v537_v61 = vpack.c.bf16 %v529_v54, %v528_v53  ;;  %v536_v62 = vpack.c.bf16 %v527_v56, %v526_v55  ;;  %v520_v63 = vsub.f32 %v1660_v13, %v512_v51  ;;  %v521_v0 = vsub.f32 %v462_v15, %v512_v51 }
 0x246   : > { %v535_v1 = vpack.c.bf16 %v525_v58, %v524_v57  ;;  %v534_v2 = vpack.c.bf16 %v523_v60, %v522_v59  ;;  %v518_v17 = vsub.f32 %v1668_v21, %v512_v51  ;;  %v519_v19 = vsub.f32 %v1670_v24, %v512_v51 }
 0x247   : > { %v552_v3 = vunpack.c.l.bf16 %v537_v61  ;;  %v553_v4 = vunpack.c.h.bf16 %v537_v61  ;;  %v550_v5 = vunpack.c.l.bf16 %v536_v62  ;;  %v551_v6 = vunpack.c.h.bf16 %v536_v62 }
 0x248   : > { %v548_v7 = vunpack.c.l.bf16 %v535_v1  ;;  %v533_v11 = vpack.c.bf16 %v521_v0, %v520_v63  ;;  %v549_v22 = vunpack.c.h.bf16 %v535_v1  ;;  %v546_v13 = vunpack.c.l.bf16 %v534_v2 }
 0x249   : > { %v582_v8 = vmul.f32 1.442695, %v552_v3  ;;  %v584_v9 = vmul.f32 1.442695, %v553_v4  ;;  %v578_v10 = vmul.f32 1.442695, %v550_v5  ;;  %v547_v15 = vunpack.c.h.bf16 %v534_v2 }
 0x24a   : > { %v580_v20 = vmul.f32 1.442695, %v551_v6  ;;  %v544_v23 = vunpack.c.l.bf16 %v533_v11  ;;  %v574_v25 = vmul.f32 1.442695, %v548_v7  ;;  %v516_v26 = vsub.f32 %v1664_v16, %v512_v51 }
 0x24b   : > { %1050 = vpow2.f32 %v582_v8  ;;  %v517_v27 = vsub.f32 %v1666_v18, %v512_v51  ;;  %v576_v28 = vmul.f32 1.442695, %v549_v22  ;;  %v545_v29 = vunpack.c.h.bf16 %v533_v11 }
 0x24c   : > { %1052 = vpow2.f32 %v584_v9  ;;  %v532_v30 = vpack.c.bf16 %v519_v19, %v518_v17  ;;  %v570_v31 = vmul.f32 1.442695, %v546_v13  ;;  %v514_v21 = vsub.f32 %v1658_v12, %v512_v51 }
 0x24d   : > { %1054 = vpow2.f32 %v578_v10  ;;  %v531_v32 = vpack.c.bf16 %v517_v27, %v516_v26  ;;  %v515_v24 = vsub.f32 %v1662_v14, %v512_v51  ;;  %v572_v33 = vmul.f32 1.442695, %v547_v15 }
 0x24e   : > { %1056 = vpow2.f32 %v580_v20  ;;  %v566_v34 = vmul.f32 1.442695, %v544_v23  ;;  %v568_v18 = vmul.f32 1.442695, %v545_v29  ;;  %v542_v39 = vunpack.c.l.bf16 %v532_v30 }
 0x24f   : > { %1058 = vpow2.f32 %v574_v25  ;;  %v540_v36 = vunpack.c.l.bf16 %v531_v32  ;;  %v541_v37 = vunpack.c.h.bf16 %v531_v32  ;;  %v530_v38 = vpack.c.bf16 %v515_v24, %v514_v21 }
 0x250   : > { %1060 = vpow2.f32 %v576_v28  ;;  %v543_v42 = vunpack.c.h.bf16 %v532_v30  ;;  %v562_v53 = vmul.f32 1.442695, %v542_v39  ;;  %v900_v28 = vld [vmem:[%s330_s4] sm:$0xff] }
 0x251   : > { %v1051_v35 = vpop.eup %1050  ;;  %1062 = vpow2.f32 %v570_v31  ;;  %v558_v43 = vmul.f32 1.442695, %v540_v36  ;;  %v560_v14 = vmul.f32 1.442695, %v541_v37  ;;  %v538_v44 = vunpack.c.l.bf16 %v530_v38 }
 0x252   : > { %v1053_v16 = vpop.eup %1052  ;;  %1064 = vpow2.f32 %v572_v33  ;;  %v539_v45 = vunpack.c.h.bf16 %v530_v38  ;;  %v564_v55 = vmul.f32 1.442695, %v543_v42  ;;  %v509_v42 = vmul.f32 1.442695, %v508_v52 }
 0x253   : > { %v1055_v40 = vpop.eup %1054  ;;  %v1695_v41 = vpack.c.bf16 %v1053_v16, %v1051_v35  ;;  %1066 = vpow2.f32 %v566_v34  ;;  %v554_v46 = vmul.f32 1.442695, %v538_v44 }
 0x254   : > { %v1057_v12 = vpop.eup %1056  ;;  %1068 = vpow2.f32 %v568_v18  ;;  %v556_v47 = vmul.f32 1.442695, %v539_v45 }
 0x255   : > { %641 = vmatpush.bf16.msra.mxu1 %v1695_v41  ;;  %v1059_v49 = vpop.eup %1058  ;;  %v1698_v51 = vpack.c.bf16 %v1057_v12, %v1055_v40  ;;  %1070 = vpow2.f32 %v558_v43  ;;  %v610_v16 = vunpack.c.l.bf16 %v1695_v41  ;;  %v611_v39 = vunpack.c.h.bf16 %v1695_v41  ;;  %v655_v41 = vld [vmem:[#allocation4] sm:$0xff] }
 0x256   : > { %v1061_v54 = vpop.eup %1060  ;;  %1072 = vpow2.f32 %v560_v14 }
 0x257   : > { %v1063_v56 = vpop.eup %1062  ;;  %1074 = vpow2.f32 %v554_v46  ;;  %v591_v59 = vpack.c.bf16 %v1061_v54, %v1059_v49  ;;  %v608_v35 = vunpack.c.l.bf16 %v1698_v51  ;;  %v609_v37 = vunpack.c.h.bf16 %v1698_v51 }
 0x258   : > { %v1065_v57 = vpop.eup %1064  ;;  %1076 = vpow2.f32 %v556_v47  ;;  %v594_v47 = vld [vmem:[#allocation3] sm:$0x1] }
 0x259   : > { %642 = vmatpush.bf16.msra.mxu1 %v1698_v51  ;;  %v1067_v58 = vpop.eup %1066  ;;  %1078 = vpow2.f32 %v562_v53  ;;  %v590_v0 = vpack.c.bf16 %v1065_v57, %v1063_v56  ;;  %v606_v21 = vunpack.c.l.bf16 %v591_v59  ;;  %v607_v33 = vunpack.c.h.bf16 %v591_v59 }
 0x25a   : > { %v1069_v60 = vpop.eup %1068  ;;  %1080 = vpow2.f32 %v564_v55 }
 0x25b   : > { %v1071_v61 = vpop.eup %1070  ;;  %v589_v6 = vpack.c.bf16 %v1069_v60, %v1067_v58  ;;  %v604_v29 = vunpack.c.l.bf16 %v590_v0  ;;  %v605_v31 = vunpack.c.h.bf16 %v590_v0  ;;  %1082 = vpow2.f32 %v509_v42 }
 0x25c   : > { %v1073_v62 = vpop.eup %1072 }
 0x25d   : > { %643 = vmatpush.bf16.msra.mxu1 %v591_v59  ;;  %v1075_v63 = vpop.eup %1074  ;;  %v587_v3 = vpack.c.bf16 %v1073_v62, %v1071_v61  ;;  %v602_v23 = vunpack.c.l.bf16 %v589_v6  ;;  %v603_v26 = vunpack.c.h.bf16 %v589_v6 }
 0x25e   : > { %v1077_v1 = vpop.eup %1076 }
 0x25f   : > { %v1079_v2 = vpop.eup %1078  ;;  %v586_v4 = vpack.c.bf16 %v1077_v1, %v1075_v63  ;;  %v598_v10 = vunpack.c.l.bf16 %v587_v3  ;;  %v599_v20 = vunpack.c.h.bf16 %v587_v3 }
 0x260   : > { %v1081_v5 = vpop.eup %1080 }
 0x261   : > { %644 = vmatpush.bf16.msra.mxu1 %v590_v0  ;;  %v596_v7 = vunpack.c.l.bf16 %v586_v4  ;;  %v597_v8 = vunpack.c.h.bf16 %v586_v4  ;;  %v588_v9 = vpack.c.bf16 %v1081_v5, %v1079_v2  ;;  %v1083_v46 = vpop.eup %1082 }
 0x262   : > { %v595_v53 = vmul.f32 %v1083_v46, %v594_v47  ;;  %v658_v55 = vperm.slane %v1083_v46, 0 }
 0x263   : > { %v612_v11 = vadd.f32 %v597_v8, %v596_v7  ;;  %v600_v17 = vunpack.c.l.bf16 %v588_v9  ;;  %v601_v13 = vunpack.c.h.bf16 %v588_v9 }
 0x264   : > { %v660_v56 = vmul.f32 %v658_v55, %v655_v41  ;;  %v661_v50 = vmul.f32 %v658_v55, %v656_v48 }
 0x265   : > { %645 = vmatpush.bf16.msra.mxu1 %v589_v6  ;;  %v613_v22 = vadd.f32 %v612_v11, %v598_v10 }
 0x267   : > { %v614_v19 = vadd.f32 %v613_v22, %v599_v20 }
 0x269   : > { %646 = vmatpush.bf16.msra.mxu1 %v588_v9  ;;  %v615_v15 = vadd.f32 %v614_v19, %v600_v17 }
 0x26b   : > { %v616_v25 = vadd.f32 %v615_v15, %v601_v13 }
 0x26d   : > { %647 = vmatpush.bf16.msra.mxu1 %v587_v3  ;;  %v617_v27 = vadd.f32 %v616_v25, %v602_v23 }
 0x26f   : > { %v618_v30 = vadd.f32 %v617_v27, %v603_v26 }
 0x271   : > { %648 = vmatpush.bf16.msra.mxu1 %v586_v4  ;;  %v619_v32 = vadd.f32 %v618_v30, %v604_v29 }
 0x273   : > { %v620_v24 = vadd.f32 %v619_v32, %v605_v31 }
 0x274   : > { %649 = vmatmul.bf16.vlgmr.msra.gmra.mxu1 %v900_v28 }
 0x275   : > { %v621_v34 = vadd.f32 %v620_v24, %v606_v21 }
 0x277   : > { %v622_v36 = vadd.f32 %v621_v34, %v607_v33 }
 0x279   : > { %v623_v38 = vadd.f32 %v622_v36, %v608_v35 }
 0x27b   : > { %v624_v18 = vadd.f32 %v623_v38, %v609_v37 }
 0x27d   : > { %v625_v40 = vadd.f32 %v624_v18, %v610_v16 }
 0x27f   : > { %v626_v43 = vadd.f32 %v625_v40, %v611_v39 }
 0x281   : > { %v627_v12 = vrot.slane %v626_v43, 4 }
 0x283   : > { %v628_v14 = vadd.f32 %v627_v12, %v626_v43 }
 0x285   : > { %v629_v44 = vrot.slane %v628_v14, 2 }
 0x287   : > { %v630_v45 = vadd.f32 %v629_v44, %v628_v14 }
 0x289   : > { %v631_v49 = vrot.slane %v630_v45, 1 }
 0x28b   : > { %v632_v51 = vadd.f32 %v631_v49, %v630_v45 }
 0x28d   : > { %v633_v54 = vadd.f32 %v632_v51, %v595_v53 }
 0x28f   : > { %634 = vst [vmem:[#allocation3] sm:$0x1] %v633_v54 }
 0x2f1   : > { %v650_v57 = vpop.f32.mrf.mxu1 }
 0x2f2   : > { %v662_v58 = vadd.f32 %v660_v56, %v650_v57 }
 0x2f4   : > { %664 = vst [vmem:[#allocation4] sm:$0xff] %v662_v58 }
 0x2f8   : > { %670 = sbr.rel (%p892_p2) target bundleno = 783 (0x30f), region = 64 }
 0x2f9   : > { %v652_v52 = vpop.f32.mrf.mxu1 }
 0x2fa   : > { %v663_v59 = vadd.f32 %v661_v50, %v652_v52 }
 0x2fc   : > { %665 = vst [vmem:[#allocation4 + $0x8] sm:$0xff] %v663_v59 }
 0x2fd   : > { %v672_v60 = vld [vmem:[#allocation3] sm:$0x1]  ;;  %v674_v62 = vld [vmem:[#allocation4] sm:$0xff]  ;;  %v681_v1 = vstv %s671_s5 }
 0x2fe   : > { %1084 = vrcp.f32 %v672_v60  ;;  %v684_v4 = vld [vmem:[#allocation12] sm:$0xff]  ;;  %v685_v5 = vld [vmem:[#allocation12 + $0x8] sm:$0xff] }
 0x303   : > { %v675_v63 = vld [vmem:[#allocation4 + $0x8] sm:$0xff] }
 0x304   : > { %v1085_v61 = vpop.eup %1084 }
 0x305   : > { %v677_v0 = vperm.slane %v1085_v61, 0 }
 0x307   : > { %v679_v2 = vmul.f32 %v677_v0, %v674_v62  ;;  %v680_v3 = vmul.f32 %v677_v0, %v675_v63 }
 0x309   : > { %v682_v6 = vmul.f32 %v681_v1, %v679_v2  ;;  %v683_v7 = vmul.f32 %v681_v1, %v680_v3 }
 0x30b   : > { %v686_v8 = vadd.f32 %v684_v4, %v682_v6  ;;  %v687_v9 = vadd.f32 %v685_v5, %v683_v7 }
 0x30d   : > { %688 = vst [vmem:[%s1647_s0] sm:$0xff] %v686_v8 }
 0x30e   : > { %689 = vst [vmem:[%s1647_s0 + $0x8] sm:$0xff] %v687_v9 }
 0x30f PF: > { %s1850_s8 = sshll.u32 %s1567_s20, 3  ;;  %s1851_s25 = sld [smem:[#allocation37_spill]] }
 0x310   : > { %s704_s11 = sshll.u32 %s1647_s0, 4  ;;  %s691_s28 = scalar_lea.sflag [#allocation8], %s365_s27  ;;  %s705_s11 = int_to_ptr.vmem [resolvable:$true] %s704_s11 }
 0x315   : > { %s1852_s9 = smov %s1851_s25  ;;  %s703_s29 = scalar_lea.hbm %s1851_s25, %s1850_s8 }
 0x316   : > { %s706_s16 = sshll.u32 %s703_s29, 4  ;;  %s1226_s2 = scalar_lea.hbm %s1852_s9, 64  ;;  %s707_s16 = int_to_ptr.hbm [resolvable:$true] %s706_s16 }
 0x317   : > { %s1220_s17 = sshra.s32 %s707_s16, 4  ;;  %s1221_s17 = int_to_ptr.hbm [resolvable:$true] %s1220_s17 }
 0x318   : > { %s1222_s26 = scalar_lea.hbm %s1221_s17, 16  ;;  %p1227_p13 = scmp.lt.s32.totalorder %s1221_s17, %s1852_s9 }
 0x319   : > { %p1223_p3 = scmp.ne.s32.totalorder %s1221_s17, %s1222_s26  ;;  %p1228_p12 = scmp.lt.s32.totalorder %s1226_s2, %s1222_s26 }
 0x31b   : > { %p1224_p9 = pnand %p1223_p3, %p1551_p5  ;;  %p1229_p0 = por %p1228_p12, %p1227_p13 }
 0x31d   : > { %p1225_p11 = pneg %p1224_p9 }
 0x31f   : > { %p1230_p6 = pnand %p1229_p0, %p1225_p11 }
 0x321   : > { %1233 = shalt.err (!%p1230_p6)
}
 0x322   : > { %s1363_s15 = smov 128   ;;  %s1364_s1 = smov 256  }
 0x323   : > { %s1365_s4 = smov 8  }
 0x324   : > { %911 = dma.vmem_to_hbm [thread:$0]  (%p1551_p5), %s705_s11, 256, %s707_s16, %s691_s28, %s1363_s15, %s1364_s1, %s1365_s4  }
 0x325 PF: > { %s1853_s27 = sld [smem:[#allocation20_spill]]  ;;  %p932_p1 = scmp.ge.s32.totalorder %s1352_s6, 2 }
 0x326   : > { %s1854_s18 = sld [smem:[#allocation23_spill]] }
 0x32b   : > { %s721_s0 = sand.u32 1, %s1853_s27  }
 0x32c   : > { %p1855_p7 = scmp.ne.s32.totalorder %s1854_s18, 0  ;;  %s722_s30 = scalar_lea.sflag [#allocation8], %s721_s0 }
 0x32e   : > { %p928_p8 = pnand %p932_p1, %p1855_p7 }
 0x330   : > { %p929_p4 = pneg %p928_p8 }
 0x332   : > { %1299 = dma.done.wait (%p929_p4), %s722_s30, 256  }
 0x333   : > { %1301 = vsyncadd (%p929_p4), %s722_s30, 4294967040  ;;  %s24_s6 = sadd.s32 1, %s1352_s6   ;;  %s1857_s12 = sld [smem:[#allocation19_spill]] }
 0x334   : > { %p1736_p10 = scmp.ge.s32.totalorder %s24_s6, 10   ;;  %s1858_s22 = sld [smem:[#allocation32_spill]] }
 0x335   : > { %s1859_s5 = sld [smem:[#allocation21_spill]]  ;;  %s1867_s20 = smov %s1308_s21 }
 0x336   : > { %s1860_s25 = sld [smem:[#allocation31_spill]]  ;;  %s1869_s23 = smov %s1320_s24 }
 0x337   : > { %s1861_s26 = sld [smem:[#allocation25_spill]] }
 0x338   : > { %s1862_s4 = sld [smem:[#allocation26_spill]]  ;;  %23 = sbr.rel (!%p1736_p10) target bundleno = 19 (0x13), region = 115 }
 0x339   : > { %s1863_s27 = sld [smem:[#allocation27_spill]]  ;;  %s1868_s21 = smov %s1857_s12 }
 0x33a   : > { %s1864_s28 = sld [smem:[#allocation28_spill]] }
 0x33b   : > { %s1865_s29 = sld [smem:[#allocation29_spill]]  ;;  %s1870_s24 = smov %s1859_s5 }
 0x33c   : > { %s1866_s30 = sld [smem:[#allocation30_spill]] }
 0x33d   :  { %728 = vsyncpa [#allocation7], 1 }
 0x33e   :  { %730 = vsyncpa [#allocation7 + $0x1], 1 }
 0x33f   :  { %731 = vsyncpa [#allocation10], 1 }
 0x340   :  { %733 = vsyncpa [#allocation10 + $0x1], 1 }
 0x341   :  { %734 = vsyncpa [#allocation13], 1 }
 0x342   :  { %735 = vsyncpa [#allocation8], 1 }
 0x343   :  { %737 = vsyncpa [#allocation8 + $0x1], 1 }

// kernel: tpu_custom_call.1
= control target key start
LH: loop header
LB: loop body
LE: loop exit
PB: predicated region body
PF: predicated region fallthrough
CT: control target
= control target key end

     0   :  { %s1851_s0 = inlined_call_operand.hbm [shape: bf16[2,16,256], index: 0, kind: input, shape index: {}]   ;;  %s1852_s1 = inlined_call_operand.hbm [shape: bf16[2,16,256], index: 1, kind: input, shape index: {}]   ;;  %s1853_s2 = inlined_call_operand.hbm [shape: bf16[2,16,256], index: 2, kind: input, shape index: {}]   ;;  %s1854_s3 = inlined_call_operand.hbm [shape: f32[2,16,256], index: 3, kind: input, shape index: {}]   ;;  %s1855_s4 = inlined_call_operand.<no memory space> [shape: f32[1,1], index: 4, kind: input, shape index: {}]   ;;  %s1856_s5 = inlined_call_operand.hbm [shape: f32[2,16,256], index: 5, kind: output, shape index: {}]  }
   0x1   :  { %1881 = sst [smem:[#allocation36_spill]] %s1852_s1 }
   0x2   :  { %1882 = sst [smem:[#allocation37_spill]] %s1853_s2 }
   0x3   :  { %1883 = sst [smem:[#allocation38_spill]] %s1856_s5 }
   0x4   :  { %10 = sst [smem:[#allocation5]] %s1855_s4 }
   0x5   :  { %11 = vsyncpa [#allocation7], 0 }
   0x6   :  { %13 = vsyncpa [#allocation7 + $0x1], 0 }
   0x7   :  { %14 = vsyncpa [#allocation10], 0 }
   0x8   :  { %16 = vsyncpa [#allocation10 + $0x1], 0 }
   0x9   :  { %17 = vsyncpa [#allocation13], 0 }
   0xa   :  { %19 = vsyncpa [#allocation13 + $0x1], 0 }
   0xb   :  { %20 = vsyncpa [#allocation8], 0 }
   0xc   :  { %22 = vsyncpa [#allocation8 + $0x1], 0  ;;  %s1452_s20 = smov 0   ;;  %s1454_s21 = smov 0  }
   0xd   :  { %s1456_s22 = smov 0   ;;  %s1458_s23 = smov 0  }
   0xe   :  { %s1460_s24 = smov 0   ;;  %s1462_s25 = smov 0  }
   0xf   :  { %s1464_s4 = smov 0   ;;  %s1466_s26 = smov 0  }
  0x10   :  { %s1468_s27 = smov 0   ;;  %s1470_s28 = smov 0  }
  0x11   :  { %s1472_s29 = smov 0   ;;  %s1474_s30 = smov 0  }
  0x12   :  { %s1476_s6 = smov 0  }
  0x13 LB: > { %1884 = sst [smem:[#allocation19_spill]] %s1363_s21  ;;  %s1516_s7 = sadd.s32 4294967295, %s1407_s6   ;;  %s1407_s6 = sphi %s1476_s6, %s28_s6   ;;  %s1403_s30 = sphi %s1474_s30, %s1953_s30   ;;  %s1399_s29 = sphi %s1472_s29, %s1952_s29   ;;  %s1395_s28 = sphi %s1470_s28, %s1951_s28   ;;  %s1391_s27 = sphi %s1468_s27, %s1941_s27   ;;  %s1387_s26 = sphi %s1466_s26, %s1940_s26   ;;  %s1383_s4 = sphi %s1464_s4, %s1950_s4   ;;  %s1379_s25 = sphi %s1462_s25, %s1949_s25   ;;  %s1375_s24 = sphi %s1460_s24, %s1948_s24   ;;  %s1371_s23 = sphi %s1458_s23, %s1947_s23   ;;  %s1367_s22 = sphi %s1456_s22, %s1946_s22   ;;  %s1363_s21 = sphi %s1454_s21, %s1945_s21   ;;  %s1359_s20 = sphi %s1452_s20, %s1937_s20  }
  0x14   : > { %1885 = sst [smem:[#allocation20_spill]] %s1371_s23  ;;  %s40_s8 = sadd.s32 1, %s1395_s28 }
  0x15   : > { %1886 = sst [smem:[#allocation21_spill]] %s1375_s24  ;;  %p1519_p0 = scmp.ge.s32.totalorder %s40_s8, 2 }
  0x16   : > { %1887 = sst [smem:[#allocation22_spill]] %s1383_s4  ;;  %p64_p1 = scmp.eq.s32.totalorder %s1407_s6, 0 }
  0x17   : > { %1888 = sst [smem:[#allocation23_spill]] %s1387_s26  ;;  %p70_p2 = scmp.eq.s32.totalorder %s1516_s7, 0 }
  0x18   : > { %1889 = sst [smem:[#allocation24_spill]] %s1391_s27  ;;  %s1955_s8 = smov (%p1519_p0, %s40_s8), 0 }
  0x19   : > { %1890 = sst [smem:[#allocation25_spill]] %s1399_s29  ;;  %p91_p3 = scmp.ne.s32.totalorder %s1367_s22, %s1363_s21 }
  0x1a   : > { %1891 = sst [smem:[#allocation26_spill]] %s1403_s30  ;;  %p97_p4 = scmp.ne.s32.totalorder %s1363_s21, %s1359_s20 }
  0x1b   : > { %1892 = sst [smem:[#allocation27_spill]] %s1516_s7  ;;  %p1538_p5 = por %p91_p3, %p64_p1 }
  0x1c   : > { %p1544_p6 = por %p97_p4, %p70_p2  ;;  %p988_p7 = scmp.lt.s32.totalorder %s1407_s6, 8 }
  0x1d   : > { %s912_s15 = sshll.u32 %s1403_s30, 2  ;;  %s252_s16 = sand.u32 1, %s1407_s6  }
  0x1e   : > { %s1895_s14 = scalar_select %p1544_p6, 1, 0 }
  0x1f   : > { %s254_s17 = sand.u32 1, %s1367_s22   ;;  %s260_s19 = sadd.s32 %s1395_s28, %s912_s15 }
  0x20   : > { %1896 = sst [smem:[#allocation28_spill]] %s1895_s14  ;;  %s914_s18 = sshll.u32 %s254_s17, 3 }
  0x21   : > { %s916_s11 = sshll.u32 %s260_s19, 2  ;;  %s256_s20 = scalar_lea.vmem [#allocation9], %s914_s18 }
  0x22   : > { %s265_s12 = sshll.u32 %s256_s20, 4  ;;  %s1897_s1 = sld [smem:[#allocation36_spill]]  ;;  %s266_s12 = int_to_ptr.vmem [resolvable:$true] %s265_s12 }
  0x23   : > { %p1562_p8 = pnand %p988_p7, %p1538_p5  ;;  %s1899_s2 = sld [smem:[#allocation37_spill]] }
  0x24   : > { %s1569_s5 = scalar_lea.sflag [#allocation10], %s252_s16  ;;  %s1860_s10 = smov 64  }
  0x25   : > { %s1862_s13 = smov 4   ;;  %s279_s16 = scalar_lea.vmem [#allocation11], %s914_s18 }
  0x26   : > { %s1577_s17 = sshll.u32 %s279_s16, 4  ;;  %p923_p9 = scmp.ge.s32.totalorder %s1407_s6, 1 }
  0x27   : > { %1900 = sst [smem:[#allocation29_spill]] %s1577_s17  ;;  %p319_p10 = scmp.lt.s32.totalorder %s1407_s6, 9 }
  0x28   : > { %s262_s26 = scalar_lea.hbm %s1897_s1, %s916_s11  ;;  %s43_s18 = sadd.s32 1, %s1399_s29 }
  0x29   : > { %s263_s27 = sshll.u32 %s262_s26, 4  ;;  %s285_s20 = scalar_lea.hbm %s1899_s2, %s916_s11  ;;  %s264_s27 = int_to_ptr.hbm [resolvable:$true] %s263_s27 }
  0x2a   : > { %s1858_s26 = smov 128   ;;  %s286_s11 = sshll.u32 %s285_s20, 4  ;;  %s1579_s11 = int_to_ptr.hbm [resolvable:$true] %s286_s11 }
  0x2b   : > { %977 = dma.hbm_to_vmem [thread:$0]  (!%p1562_p8), %s264_s27, 128, %s266_s12, %s1569_s5, %s1858_s26, %s1860_s10, %s1862_s13  }
  0x2c   : > { %p1584_p11 = pnand %p923_p9, %p319_p10  ;;  %s908_s12 = sadd.s32 4294967294, %s1407_s6  }
  0x2d   : > { %s56_s19 = sadd.s32 1, %s1379_s25  ;;  %s1957_s18 = smov (!%p1519_p0, %s43_s18), %s1399_s29 }
  0x2e   : > { %s1901_s27 = scalar_select %p1584_p11, 1, 0 }
  0x2f   : > { %p63_p12 = scmp.ne.s32.totalorder %s1379_s25, %s1375_s24  ;;  %p69_p13 = scmp.ne.s32.totalorder %s1375_s24, %s1371_s23 }
  0x30   : > { %1902 = sst [smem:[#allocation30_spill]] %s1901_s27  ;;  %p45_p3 = scmp.ge.s32.totalorder %s1957_s18, 2 }
  0x31   : > { %p200_p4 = scmp.eq.s32.totalorder %s1516_s7, 7  ;;  %p1601_p5 = por %p64_p1, %p63_p12 }
  0x32   : > { %p1610_p9 = por %p70_p2, %p69_p13  ;;  %s1959_s18 = smov (%p45_p3, %s1957_s18), 0 }
  0x33   : > { %1906 = sst [smem:[#allocation32_spill]] %s1959_s18  ;;  %s1907_s9 = sadd.s32 1, %s1403_s30 }
  0x34   : > { %s1904_s16 = scalar_select %p1610_p9, 1, 0 }
  0x35   : > { %s1961_s9 = smov (!%p45_p3, %s1907_s9), %s1403_s30  ;;  %s52_s26 = ssub.s32 %s1399_s29, %s1959_s18 }
  0x36   : > { %1905 = sst [smem:[#allocation31_spill]] %s1904_s16  ;;  %p1621_p0 = por %p200_p4, %p63_p12 }
  0x37   : > { %p49_p1 = scmp.ge.s32.totalorder %s1961_s9, 2  ;;  %p206_p10 = scmp.eq.s32.totalorder %s908_s12, 7 }
  0x38   : > { %s1908_s10 = scalar_select %p1621_p0, 1, 0 }
  0x39   : > { %s1626_s13 = sand.u32 1, %s1379_s25   ;;  %s237_s17 = sadd.s32 %s1399_s29, %s912_s15 }
  0x3a   : > { %1909 = sst [smem:[#allocation33_spill]] %s1908_s10  ;;  %s1963_s9 = smov (%p49_p1, %s1961_s9), 0 }
  0x3b   : > { %1910 = sst [smem:[#allocation34_spill]] %s1963_s9  ;;  %p1636_p2 = por %p206_p10, %p69_p13 }
  0x3c   : > { %s51_s2 = ssub.s32 %s1403_s30, %s1963_s9  ;;  %s1913_s18 = sld [smem:[#allocation29_spill]] }
  0x3d   : > { %s1911_s1 = scalar_select %p1636_p2, 1, 0 }
  0x3e   : > { %s911_s12 = sshll.u32 %s1626_s13, 3  ;;  %s53_s10 = sor.u32 %s52_s26, %s51_s2 }
  0x3f   : > { %1912 = sst [smem:[#allocation35_spill]] %s1911_s1  ;;  %s1914_s14 = ssub.s32 %s1395_s28, %s1955_s8 }
  0x40   : > { %s81_s15 = sor.u32 %s1914_s14, %s51_s2  ;;  %p54_p12 = scmp.eq.s32.totalorder %s53_s10, 0 }
  0x41   : > { %p82_p3 = scmp.eq.s32.totalorder %s81_s15, 0  ;;  %s913_s29 = sshll.u32 %s237_s17, 2 }
  0x42   : > { %s1647_s23 = scalar_select %p54_p12, %s1379_s25, %s56_s19  }
  0x43   : > { %s1915_s21 = sadd.s32 1, %s1367_s22  ;;  %s239_s30 = scalar_lea.hbm %s1851_s0, %s913_s29 }
  0x44   : > { %s1652_s1 = scalar_select %p82_p3, %s1367_s22, %s1915_s21  }
  0x45   : > { %s233_s16 = scalar_lea.vmem [#allocation6], %s911_s12  ;;  %s240_s27 = sshll.u32 %s239_s30, 4  ;;  %s241_s27 = int_to_ptr.hbm [resolvable:$true] %s240_s27 }
  0x46   : > { %s242_s24 = sshll.u32 %s233_s16, 4  ;;  %p1661_p13 = pnand %p988_p7, %p1601_p5  ;;  %s243_s24 = int_to_ptr.vmem [resolvable:$true] %s242_s24 }
  0x47   : > { %s1917_s14 = smov 4   ;;  %s1918_s21 = smov 64  }
  0x48   : > { %s1919_s26 = smov 128   ;;  %s1920_s10 = int_to_ptr.vmem [resolvable:$true] %s1913_s18 }
  0x49   : > { %980 = dma.hbm_to_vmem [thread:$0]  (!%p1562_p8), %s1579_s11, 128, %s1920_s10, %s1569_s5, %s1919_s26, %s1918_s21, %s1917_s14  }
  0x4a   : > { %s230_s29 = scalar_lea.sflag [#allocation7], %s1626_s13  ;;  %s920_s30 = sshll.u32 %s1626_s13, 4 }
  0x4b   : > { %974 = dma.hbm_to_vmem [thread:$0]  (!%p1661_p13), %s241_s27, 128, %s243_s24, %s230_s29, %s1919_s26, %s1918_s21, %s1917_s14  }
  0x4c   : > { %s922_s7 = sshll.u32 %s237_s17, 3  ;;  %s302_s9 = scalar_lea.vmem [#allocation12], %s920_s30 }
  0x4d   : > { %s308_s16 = scalar_lea.hbm %s1854_s3, %s922_s7  ;;  %s311_s12 = sshll.u32 %s302_s9, 4  ;;  %s312_s12 = int_to_ptr.vmem [resolvable:$true] %s311_s12 }
  0x4e   : > { %s309_s4 = sshll.u32 %s308_s16, 4  ;;  %s299_s18 = scalar_lea.sflag [#allocation13], %s1626_s13  ;;  %s310_s4 = int_to_ptr.hbm [resolvable:$true] %s309_s4 }
  0x4f   : > { %s1412_s15 = smov 256   ;;  %s1413_s5 = smov 8  }
  0x50   : > { %983 = dma.hbm_to_vmem [thread:$0]  (!%p1661_p13), %s310_s4, 256, %s312_s12, %s299_s18, %s1412_s15, %s1919_s26, %s1413_s5  }
  0x51   : > { %323 = sbr.rel (%p1584_p11) target bundleno = 800 (0x320), region = 40  ;;  %s1922_s24 = sld [smem:[#allocation21_spill]] (!%p1584_p11) }
  0x57   : > { %s1691_s27 = sand.u32 1, %s1922_s24  }
  0x58   : > { %s924_s14 = sshll.u32 %s1691_s27, 3  ;;  %s326_s21 = scalar_lea.sflag [#allocation7], %s1691_s27 }
  0x59   : > { %s329_s10 = scalar_lea.vmem [#allocation6], %s924_s14 }
  0x5a   : > { %1342 = dma.done.wait (%p1610_p9), %s326_s21, 128  }
  0x5b   : > { %1344 = vsyncadd (%p1610_p9), %s326_s21, 4294967168  ;;  %s1924_s13 = sld [smem:[#allocation27_spill]] }
  0x5c   : > { %s1925_s2 = sld [smem:[#allocation19_spill]] }
  0x61   : > { %s335_s29 = sand.u32 1, %s1924_s13  }
  0x62   : > { %s337_s30 = sand.u32 1, %s1925_s2   ;;  %s336_s19 = scalar_lea.sflag [#allocation10], %s335_s29 }
  0x63   : > { %s1701_s7 = sshll.u32 %s337_s30, 3 }
  0x64   : > { %s339_s20 = scalar_lea.vmem [#allocation9], %s1701_s7 }
  0x65   : > { %1346 = dma.done.wait (%p1544_p6), %s336_s19, 256  }
  0x66   : > { %1348 = vsyncadd (%p1544_p6), %s336_s19, 4294967040  ;;  %s927_s16 = sshll.u32 %s1691_s27, 4  ;;  %s349_s4 = scalar_lea.vmem [#allocation11], %s1701_s7 }
  0x67   : > { %s356_s9 = scalar_lea.sflag [#allocation13], %s1691_s27  ;;  %s1711_s12 = scalar_lea.vmem [#allocation12], %s927_s16 }
  0x68   : > { %1350 = dma.done.wait (%p1610_p9), %s356_s9, 256  }
  0x69   : > { %1352 = vsyncadd (%p1610_p9), %s356_s9, 4294967040  ;;  %s1717_s18 = scalar_lea.vmem [#allocation14], %s927_s16  ;;  %s1927_s15 = sld [smem:[#allocation22_spill]] }
  0x6f   : > { %p929_p7 = scmp.ne.s32.totalorder %s1927_s15, 0 }
  0x71   : > { %406 = sbr.rel (%p929_p7) target bundleno = 123 (0x7b), region = 60 }
  0x76   : > { %v1414_v0 = vmov -inf   ;;  %v1415_v1 = vmov 0.0  }
  0x77   : > { %407 = vst [vmem:[#allocation2] sm:$0x1] %v1414_v0 }
  0x78   : > { %408 = vst [vmem:[#allocation3] sm:$0x1] %v1415_v1 }
  0x79   : > { %409 = vst [vmem:[#allocation4] sm:$0xff] %v1415_v1 }
  0x7a   : > { %410 = vst [vmem:[#allocation4 + $0x8] sm:$0xff] %v1415_v1 }
  0x7b PF: > { %v957_v2 = vld [vmem:[%s339_s20] sm:$0xff]  ;;  %v956_v3 = vld [vmem:[%s329_s10] sm:$0xff]  ;;  %vm445_vm0 = vcmask 130048   ;;  %s1928_s5 = sld [smem:[#allocation22_spill]] }
  0x7c   : > { %423 = vxpose.xlu0.c.b16.start.end [1/1] (short) %v957_v2, 128  ;;  %477 = vmatpush.bf16.msra.mxu0 %v956_v3 }
  0x7d   : > { %959 = vmatpush.bf16.msra.mxu2 %v956_v3  ;;  %960 = vmatpush.bf16.msra.mxu3 %v956_v3 }
  0x7e   : > { %v1749_v48 = vld [vmem:[#allocation2] sm:$0x1] }
  0x81   : > { %p950_p6 = scmp.ne.s32.totalorder %s1928_s5, 1 }
  0x82   : > { %s705_s11 = sld [smem:[#allocation5]] (!%p950_p6) }
 0x128   : > { %v431_v4 = vpop.trf.xlu0 }
 0x129   : > { %938 = vmatmul.msk.bf16.vlgmr.msra.gmra.mxu0 %vm445_vm0, %v431_v4 }
 0x138   : > { %v432_v5 = vpop.trf.xlu0 }
 0x139   : > { %939 = vmatmul.msk.bf16.gmra.mxu0 %vm445_vm0, %v432_v5 }
 0x148   : > { %v433_v6 = vpop.trf.xlu0 }
 0x149   : > { %940 = vmatmul.msk.bf16.gmra.mxu0 %vm445_vm0, %v433_v6 }
 0x158   : > { %v434_v7 = vpop.trf.xlu0 }
 0x159   : > { %941 = vmatmul.msk.bf16.vlgmr.msra.gmra.mxu2 %vm445_vm0, %v434_v7 }
 0x168   : > { %v435_v8 = vpop.trf.xlu0 }
 0x169   : > { %942 = vmatmul.msk.bf16.gmra.mxu2 %vm445_vm0, %v435_v8 }
 0x178   : > { %v436_v9 = vpop.trf.xlu0 }
 0x179   : > { %943 = vmatmul.msk.bf16.gmra.mxu2 %vm445_vm0, %v436_v9 }
 0x188   : > { %v437_v10 = vpop.trf.xlu0 }
 0x189   : > { %944 = vmatmul.msk.bf16.vlgmr.msra.gmra.mxu3 %vm445_vm0, %v437_v10 }
 0x198   : > { %v438_v11 = vpop.trf.xlu0 }
 0x199   : > { %945 = vmatmul.msk.bf16.gmra.mxu3 %vm445_vm0, %v438_v11 }
 0x1a6   : > { %v1728_v12 = vpop.f32.mrf.mxu0 }
 0x1ae   : > { %v1732_v14 = vpop.f32.mrf.mxu0 }
 0x1b6   : > { %v1734_v16 = vpop.f32.mrf.mxu0 }
 0x1be   : > { %v1736_v18 = vpop.f32.mrf.mxu0 }
 0x1c6   : > { %v1738_v21 = vpop.f32.mrf.mxu0 }
 0x1c7   : > { %v520_v28 = vmax.f32 %v1728_v12, %v1738_v21 }
 0x1ce   : > { %v1740_v24 = vpop.f32.mrf.mxu0 }
 0x1cf   : > { %v521_v26 = vmax.f32 %v1732_v14, %v1740_v24 }
 0x1dc   : > { %v1730_v13 = vpop.f32.mrf.mxu2 }
 0x1dd   : > { %v522_v29 = vmax.f32 %v1734_v16, %v1730_v13 }
 0x1e4   : > { %v496_v15 = vpop.f32.mrf.mxu2 }
 0x1e5   : > { %v523_v30 = vmax.f32 %v1736_v18, %v496_v15 }
 0x1ec   : > { %v499_v17 = vpop.f32.mrf.mxu2 }
 0x1ed   : > { %v524_v32 = vmax.f32 %v520_v28, %v499_v17 }
 0x1f4   : > { %v501_v19 = vpop.f32.mrf.mxu2 }
 0x1f5   : > { %v525_v31 = vmax.f32 %v521_v26, %v501_v19 }
 0x1fc   : > { %v504_v23 = vpop.f32.mrf.mxu2 }
 0x1fd   : > { %v526_v33 = vmax.f32 %v522_v29, %v504_v23 }
 0x204   : > { %v506_v27 = vpop.f32.mrf.mxu2 }
 0x205   : > { %v527_v34 = vmax.f32 %v523_v30, %v506_v27 }
 0x20c   : > { %v509_v20 = vpop.f32.mrf.mxu3 }
 0x20d   : > { %v528_v37 = vmax.f32 %v524_v32, %v509_v20 }
 0x214   : > { %v511_v22 = vpop.f32.mrf.mxu3 }
 0x215   : > { %v529_v35 = vmax.f32 %v525_v31, %v511_v22 }
 0x217   : > { %v532_v40 = vmax.f32 %v528_v37, %v529_v35 }
 0x21c   : > { %v514_v25 = vpop.f32.mrf.mxu3 }
 0x21d   : > { %v530_v38 = vmax.f32 %v526_v33, %v514_v25 }
 0x224   : > { %v516_v36 = vpop.f32.mrf.mxu3 }
 0x225   : > { %v531_v39 = vmax.f32 %v527_v34, %v516_v36 }
 0x227   : > { %v533_v41 = vmax.f32 %v530_v38, %v531_v39 }
 0x229   : > { %v534_v42 = vmax.f32 %v532_v40, %v533_v41 }
 0x22b   : > { %v535_v43 = vrot.slane %v534_v42, 4 }
 0x22d   : > { %v536_v44 = vmax.f32 %v534_v42, %v535_v43 }
 0x22f   : > { %v537_v45 = vrot.slane %v536_v44, 2 }
 0x231   : > { %v538_v46 = vmax.f32 %v536_v44, %v537_v45 }
 0x233   : > { %v539_v47 = vrot.slane %v538_v46, 1 }
 0x235   : > { %v540_v49 = vmax.f32 %v538_v46, %v539_v47 }
 0x237   : > { %v1752_v50 = vmax.f32 %v1749_v48, %v540_v49 }
 0x239   : > { %v546_v51 = vperm.slane %v1752_v50, 0  ;;  %700 = vst [vmem:[#allocation2] sm:$0x1] %v1752_v50  ;;  %v542_v52 = vsub.f32 %v1749_v48, %v1752_v50  ;;  %v690_v48 = vld [vmem:[#allocation4 + $0x8] sm:$0xff] }
 0x23b   : > { %v562_v53 = vsub.f32 %v514_v25, %v546_v51  ;;  %v563_v54 = vsub.f32 %v516_v36, %v546_v51  ;;  %v560_v55 = vsub.f32 %v509_v20, %v546_v51  ;;  %v561_v56 = vsub.f32 %v511_v22, %v546_v51 }
 0x23c   : > { %v558_v57 = vsub.f32 %v504_v23, %v546_v51  ;;  %v559_v58 = vsub.f32 %v506_v27, %v546_v51  ;;  %v556_v59 = vsub.f32 %v499_v17, %v546_v51  ;;  %v557_v60 = vsub.f32 %v501_v19, %v546_v51 }
 0x23d   : > { %v571_v61 = vpack.c.bf16 %v563_v54, %v562_v53  ;;  %v570_v62 = vpack.c.bf16 %v561_v56, %v560_v55  ;;  %v554_v63 = vsub.f32 %v1730_v13, %v546_v51  ;;  %v555_v0 = vsub.f32 %v496_v15, %v546_v51 }
 0x23e   : > { %v569_v1 = vpack.c.bf16 %v559_v58, %v558_v57  ;;  %v568_v2 = vpack.c.bf16 %v557_v60, %v556_v59  ;;  %v552_v17 = vsub.f32 %v1738_v21, %v546_v51  ;;  %v553_v19 = vsub.f32 %v1740_v24, %v546_v51 }
 0x23f   : > { %v586_v3 = vunpack.c.l.bf16 %v571_v61  ;;  %v587_v4 = vunpack.c.h.bf16 %v571_v61  ;;  %v584_v5 = vunpack.c.l.bf16 %v570_v62  ;;  %v585_v6 = vunpack.c.h.bf16 %v570_v62 }
 0x240   : > { %v582_v7 = vunpack.c.l.bf16 %v569_v1  ;;  %v567_v11 = vpack.c.bf16 %v555_v0, %v554_v63  ;;  %v583_v22 = vunpack.c.h.bf16 %v569_v1  ;;  %v580_v13 = vunpack.c.l.bf16 %v568_v2 }
 0x241   : > { %v616_v8 = vmul.f32 1.442695, %v586_v3  ;;  %v618_v9 = vmul.f32 1.442695, %v587_v4  ;;  %v612_v10 = vmul.f32 1.442695, %v584_v5  ;;  %v581_v15 = vunpack.c.h.bf16 %v568_v2 }
 0x242   : > { %v614_v20 = vmul.f32 1.442695, %v585_v6  ;;  %v578_v23 = vunpack.c.l.bf16 %v567_v11  ;;  %v608_v25 = vmul.f32 1.442695, %v582_v7  ;;  %v550_v26 = vsub.f32 %v1734_v16, %v546_v51 }
 0x243   : > { %1105 = vpow2.f32 %v616_v8  ;;  %v551_v27 = vsub.f32 %v1736_v18, %v546_v51  ;;  %v610_v28 = vmul.f32 1.442695, %v583_v22  ;;  %v579_v29 = vunpack.c.h.bf16 %v567_v11 }
 0x244   : > { %1107 = vpow2.f32 %v618_v9  ;;  %v566_v30 = vpack.c.bf16 %v553_v19, %v552_v17  ;;  %v604_v31 = vmul.f32 1.442695, %v580_v13  ;;  %v548_v21 = vsub.f32 %v1728_v12, %v546_v51 }
 0x245   : > { %1109 = vpow2.f32 %v612_v10  ;;  %v565_v32 = vpack.c.bf16 %v551_v27, %v550_v26  ;;  %v549_v24 = vsub.f32 %v1732_v14, %v546_v51  ;;  %v606_v33 = vmul.f32 1.442695, %v581_v15 }
 0x246   : > { %1111 = vpow2.f32 %v614_v20  ;;  %v600_v34 = vmul.f32 1.442695, %v578_v23  ;;  %v602_v18 = vmul.f32 1.442695, %v579_v29  ;;  %v576_v39 = vunpack.c.l.bf16 %v566_v30 }
 0x247   : > { %1113 = vpow2.f32 %v608_v25  ;;  %v574_v36 = vunpack.c.l.bf16 %v565_v32  ;;  %v575_v37 = vunpack.c.h.bf16 %v565_v32  ;;  %v564_v38 = vpack.c.bf16 %v549_v24, %v548_v21 }
 0x248   : > { %1115 = vpow2.f32 %v610_v28  ;;  %v577_v42 = vunpack.c.h.bf16 %v566_v30  ;;  %v596_v53 = vmul.f32 1.442695, %v576_v39  ;;  %v958_v28 = vld [vmem:[%s349_s4] sm:$0xff] }
 0x249   : > { %v1106_v35 = vpop.eup %1105  ;;  %1117 = vpow2.f32 %v604_v31  ;;  %v592_v43 = vmul.f32 1.442695, %v574_v36  ;;  %v594_v14 = vmul.f32 1.442695, %v575_v37  ;;  %v572_v44 = vunpack.c.l.bf16 %v564_v38 }
 0x24a   : > { %v1108_v16 = vpop.eup %1107  ;;  %1119 = vpow2.f32 %v606_v33  ;;  %v573_v45 = vunpack.c.h.bf16 %v564_v38  ;;  %v598_v55 = vmul.f32 1.442695, %v577_v42  ;;  %v543_v42 = vmul.f32 1.442695, %v542_v52 }
 0x24b   : > { %v1110_v40 = vpop.eup %1109  ;;  %v1765_v41 = vpack.c.bf16 %v1108_v16, %v1106_v35  ;;  %1121 = vpow2.f32 %v600_v34  ;;  %v588_v46 = vmul.f32 1.442695, %v572_v44 }
 0x24c   : > { %v1112_v12 = vpop.eup %1111  ;;  %1123 = vpow2.f32 %v602_v18  ;;  %v590_v47 = vmul.f32 1.442695, %v573_v45 }
 0x24d   : > { %675 = vmatpush.bf16.msra.mxu1 %v1765_v41  ;;  %v1114_v49 = vpop.eup %1113  ;;  %v1768_v51 = vpack.c.bf16 %v1112_v12, %v1110_v40  ;;  %1125 = vpow2.f32 %v592_v43  ;;  %v644_v16 = vunpack.c.l.bf16 %v1765_v41  ;;  %v645_v39 = vunpack.c.h.bf16 %v1765_v41  ;;  %v689_v41 = vld [vmem:[#allocation4] sm:$0xff] }
 0x24e   : > { %v1116_v54 = vpop.eup %1115  ;;  %1127 = vpow2.f32 %v594_v14 }
 0x24f   : > { %v1118_v56 = vpop.eup %1117  ;;  %1129 = vpow2.f32 %v588_v46  ;;  %v625_v59 = vpack.c.bf16 %v1116_v54, %v1114_v49  ;;  %v642_v35 = vunpack.c.l.bf16 %v1768_v51  ;;  %v643_v37 = vunpack.c.h.bf16 %v1768_v51 }
 0x250   : > { %v1120_v57 = vpop.eup %1119  ;;  %1131 = vpow2.f32 %v590_v47  ;;  %v628_v47 = vld [vmem:[#allocation3] sm:$0x1] }
 0x251   : > { %676 = vmatpush.bf16.msra.mxu1 %v1768_v51  ;;  %v1122_v58 = vpop.eup %1121  ;;  %1133 = vpow2.f32 %v596_v53  ;;  %v624_v0 = vpack.c.bf16 %v1120_v57, %v1118_v56  ;;  %v640_v21 = vunpack.c.l.bf16 %v625_v59  ;;  %v641_v33 = vunpack.c.h.bf16 %v625_v59 }
 0x252   : > { %v1124_v60 = vpop.eup %1123  ;;  %1135 = vpow2.f32 %v598_v55 }
 0x253   : > { %v1126_v61 = vpop.eup %1125  ;;  %v623_v6 = vpack.c.bf16 %v1124_v60, %v1122_v58  ;;  %v638_v29 = vunpack.c.l.bf16 %v624_v0  ;;  %v639_v31 = vunpack.c.h.bf16 %v624_v0  ;;  %1137 = vpow2.f32 %v543_v42 }
 0x254   : > { %v1128_v62 = vpop.eup %1127 }
 0x255   : > { %677 = vmatpush.bf16.msra.mxu1 %v625_v59  ;;  %v1130_v63 = vpop.eup %1129  ;;  %v621_v3 = vpack.c.bf16 %v1128_v62, %v1126_v61  ;;  %v636_v23 = vunpack.c.l.bf16 %v623_v6  ;;  %v637_v26 = vunpack.c.h.bf16 %v623_v6 }
 0x256   : > { %v1132_v1 = vpop.eup %1131 }
 0x257   : > { %v1134_v2 = vpop.eup %1133  ;;  %v620_v4 = vpack.c.bf16 %v1132_v1, %v1130_v63  ;;  %v632_v10 = vunpack.c.l.bf16 %v621_v3  ;;  %v633_v20 = vunpack.c.h.bf16 %v621_v3 }
 0x258   : > { %v1136_v5 = vpop.eup %1135 }
 0x259   : > { %678 = vmatpush.bf16.msra.mxu1 %v624_v0  ;;  %v630_v7 = vunpack.c.l.bf16 %v620_v4  ;;  %v631_v8 = vunpack.c.h.bf16 %v620_v4  ;;  %v622_v9 = vpack.c.bf16 %v1136_v5, %v1134_v2  ;;  %v1138_v46 = vpop.eup %1137 }
 0x25a   : > { %v629_v53 = vmul.f32 %v1138_v46, %v628_v47  ;;  %v692_v55 = vperm.slane %v1138_v46, 0 }
 0x25b   : > { %v646_v11 = vadd.f32 %v631_v8, %v630_v7  ;;  %v634_v17 = vunpack.c.l.bf16 %v622_v9  ;;  %v635_v13 = vunpack.c.h.bf16 %v622_v9 }
 0x25c   : > { %v694_v56 = vmul.f32 %v692_v55, %v689_v41  ;;  %v695_v50 = vmul.f32 %v692_v55, %v690_v48 }
 0x25d   : > { %679 = vmatpush.bf16.msra.mxu1 %v623_v6  ;;  %v647_v22 = vadd.f32 %v646_v11, %v632_v10 }
 0x25f   : > { %v648_v19 = vadd.f32 %v647_v22, %v633_v20 }
 0x261   : > { %680 = vmatpush.bf16.msra.mxu1 %v622_v9  ;;  %v649_v15 = vadd.f32 %v648_v19, %v634_v17 }
 0x263   : > { %v650_v25 = vadd.f32 %v649_v15, %v635_v13 }
 0x265   : > { %681 = vmatpush.bf16.msra.mxu1 %v621_v3  ;;  %v651_v27 = vadd.f32 %v650_v25, %v636_v23 }
 0x267   : > { %v652_v30 = vadd.f32 %v651_v27, %v637_v26 }
 0x269   : > { %682 = vmatpush.bf16.msra.mxu1 %v620_v4  ;;  %v653_v32 = vadd.f32 %v652_v30, %v638_v29 }
 0x26b   : > { %v654_v24 = vadd.f32 %v653_v32, %v639_v31 }
 0x26c   : > { %683 = vmatmul.bf16.vlgmr.msra.gmra.mxu1 %v958_v28 }
 0x26d   : > { %v655_v34 = vadd.f32 %v654_v24, %v640_v21 }
 0x26f   : > { %v656_v36 = vadd.f32 %v655_v34, %v641_v33 }
 0x271   : > { %v657_v38 = vadd.f32 %v656_v36, %v642_v35 }
 0x273   : > { %v658_v18 = vadd.f32 %v657_v38, %v643_v37 }
 0x275   : > { %v659_v40 = vadd.f32 %v658_v18, %v644_v16 }
 0x277   : > { %v660_v43 = vadd.f32 %v659_v40, %v645_v39 }
 0x279   : > { %v661_v12 = vrot.slane %v660_v43, 4 }
 0x27b   : > { %v662_v14 = vadd.f32 %v661_v12, %v660_v43 }
 0x27d   : > { %v663_v44 = vrot.slane %v662_v14, 2 }
 0x27f   : > { %v664_v45 = vadd.f32 %v663_v44, %v662_v14 }
 0x281   : > { %v665_v49 = vrot.slane %v664_v45, 1 }
 0x283   : > { %v666_v51 = vadd.f32 %v665_v49, %v664_v45 }
 0x285   : > { %v667_v54 = vadd.f32 %v666_v51, %v629_v53 }
 0x287   : > { %668 = vst [vmem:[#allocation3] sm:$0x1] %v667_v54 }
 0x2e9   : > { %v684_v57 = vpop.f32.mrf.mxu1 }
 0x2ea   : > { %v696_v58 = vadd.f32 %v694_v56, %v684_v57 }
 0x2ec   : > { %698 = vst [vmem:[#allocation4] sm:$0xff] %v696_v58 }
 0x2f0   : > { %704 = sbr.rel (%p950_p6) target bundleno = 775 (0x307), region = 64 }
 0x2f1   : > { %v686_v52 = vpop.f32.mrf.mxu1 }
 0x2f2   : > { %v697_v59 = vadd.f32 %v695_v50, %v686_v52 }
 0x2f4   : > { %699 = vst [vmem:[#allocation4 + $0x8] sm:$0xff] %v697_v59 }
 0x2f5   : > { %v706_v60 = vld [vmem:[#allocation3] sm:$0x1]  ;;  %v708_v62 = vld [vmem:[#allocation4] sm:$0xff]  ;;  %v715_v1 = vstv %s705_s11 }
 0x2f6   : > { %1139 = vrcp.f32 %v706_v60  ;;  %v718_v4 = vld [vmem:[%s1711_s12] sm:$0xff]  ;;  %v719_v5 = vld [vmem:[%s1711_s12 + $0x8] sm:$0xff] }
 0x2fb   : > { %v709_v63 = vld [vmem:[#allocation4 + $0x8] sm:$0xff] }
 0x2fc   : > { %v1140_v61 = vpop.eup %1139 }
 0x2fd   : > { %v711_v0 = vperm.slane %v1140_v61, 0 }
 0x2ff   : > { %v713_v2 = vmul.f32 %v711_v0, %v708_v62  ;;  %v714_v3 = vmul.f32 %v711_v0, %v709_v63 }
 0x301   : > { %v716_v6 = vmul.f32 %v715_v1, %v713_v2  ;;  %v717_v7 = vmul.f32 %v715_v1, %v714_v3 }
 0x303   : > { %v720_v8 = vadd.f32 %v718_v4, %v716_v6  ;;  %v721_v9 = vadd.f32 %v719_v5, %v717_v7 }
 0x305   : > { %722 = vst [vmem:[%s1717_s18] sm:$0xff] %v720_v8 }
 0x306   : > { %723 = vst [vmem:[%s1717_s18 + $0x8] sm:$0xff] %v721_v9 }
 0x307 PF: > { %s1929_s24 = sld [smem:[#allocation24_spill]]  ;;  %s738_s13 = sshll.u32 %s1717_s18, 4  ;;  %s739_s13 = int_to_ptr.vmem [resolvable:$true] %s738_s13 }
 0x308   : > { %s1930_s17 = sld [smem:[#allocation23_spill]]  ;;  %s725_s16 = scalar_lea.sflag [#allocation8], %s1691_s27 }
 0x309   : > { %s1932_s30 = sld [smem:[#allocation38_spill]] }
 0x30d   : > { %s952_s21 = sshll.u32 %s1929_s24, 2 }
 0x30e   : > { %s735_s10 = sadd.s32 %s1930_s17, %s952_s21 }
 0x30f   : > { %s953_s2 = sshll.u32 %s735_s10, 3  ;;  %s1933_s7 = smov %s1932_s30 }
 0x310   : > { %s737_s19 = scalar_lea.hbm %s1932_s30, %s953_s2  ;;  %s1281_s18 = scalar_lea.hbm %s1933_s7, 64 }
 0x311   : > { %s740_s20 = sshll.u32 %s737_s19, 4  ;;  %s741_s20 = int_to_ptr.hbm [resolvable:$true] %s740_s20 }
 0x312   : > { %s1275_s4 = sshra.s32 %s741_s20, 4  ;;  %s1276_s4 = int_to_ptr.hbm [resolvable:$true] %s1275_s4 }
 0x313   : > { %s1277_s9 = scalar_lea.hbm %s1276_s4, 16  ;;  %p1282_p5 = scmp.lt.s32.totalorder %s1276_s4, %s1933_s7 }
 0x314   : > { %p1278_p8 = scmp.ne.s32.totalorder %s1276_s4, %s1277_s9  ;;  %p1283_p9 = scmp.lt.s32.totalorder %s1281_s18, %s1277_s9 }
 0x316   : > { %p1279_p11 = pnand %p1278_p8, %p1621_p0  ;;  %p1284_p1 = por %p1283_p9, %p1282_p5 }
 0x318   : > { %p1280_p4 = pneg %p1279_p11 }
 0x31a   : > { %p1285_p10 = pnand %p1284_p1, %p1280_p4 }
 0x31c   : > { %1288 = shalt.err (!%p1285_p10)
}
 0x31d   : > { %s1416_s27 = smov 128   ;;  %s1417_s24 = smov 256  }
 0x31e   : > { %s1418_s17 = smov 8  }
 0x31f   : > { %969 = dma.vmem_to_hbm [thread:$0]  (%p1621_p0), %s739_s13, 256, %s741_s20, %s725_s16, %s1416_s27, %s1417_s24, %s1418_s17  }
 0x320 PF: > { %s1934_s21 = sld [smem:[#allocation20_spill]]  ;;  %p989_p12 = scmp.ge.s32.totalorder %s1407_s6, 2 }
 0x322   : > { %p985_p3 = pnand %p989_p12, %p1636_p2 }
 0x324   : > { %p986_p13 = pneg %p985_p3 }
 0x326   : > { %s755_s2 = sand.u32 1, %s1934_s21  }
 0x327   : > { %s756_s26 = scalar_lea.sflag [#allocation8], %s755_s2 }
 0x328   : > { %1354 = dma.done.wait (%p986_p13), %s756_s26, 256  }
 0x329   : > { %1356 = vsyncadd (%p986_p13), %s756_s26, 4294967040  ;;  %s28_s6 = sadd.s32 1, %s1407_s6   ;;  %s1937_s20 = sld [smem:[#allocation19_spill]] }
 0x32a   : > { %p1807_p7 = scmp.ge.s32.totalorder %s28_s6, 10   ;;  %s1938_s14 = sld [smem:[#allocation21_spill]] }
 0x32b   : > { %s1939_s13 = smov %s1647_s23  ;;  %s1940_s26 = sld [smem:[#allocation25_spill]] }
 0x32c   : > { %s1941_s27 = sld [smem:[#allocation26_spill]]  ;;  %s1945_s21 = smov %s1367_s22 }
 0x32d   : > { %s1942_s30 = sld [smem:[#allocation32_spill]]  ;;  %s1946_s22 = smov %s1652_s1 }
 0x32e   : > { %s1943_s19 = sld [smem:[#allocation34_spill]]  ;;  %s1948_s24 = smov %s1379_s25 }
 0x32f   : > { %s1949_s25 = smov %s1939_s13  ;;  %s1950_s4 = smov %s1395_s28 }
 0x330   : > { %s1947_s23 = smov %s1938_s14  ;;  %s1951_s28 = smov %s1955_s8 }
 0x331   :  { %27 = sbr.rel (!%p1807_p7) target bundleno = 19 (0x13), region = 130 }
 0x333   : > { %s1952_s29 = smov %s1942_s30 }
 0x334   : > { %s1953_s30 = smov %s1943_s19 }
 0x336   :  { %762 = vsyncpa [#allocation7], 1 }
 0x337   :  { %764 = vsyncpa [#allocation7 + $0x1], 1 }
 0x338   :  { %765 = vsyncpa [#allocation10], 1 }
 0x339   :  { %767 = vsyncpa [#allocation10 + $0x1], 1 }
 0x33a   :  { %768 = vsyncpa [#allocation13], 1 }
 0x33b   :  { %770 = vsyncpa [#allocation13 + $0x1], 1 }
 0x33c   :  { %771 = vsyncpa [#allocation8], 1 }
 0x33d   :  { %773 = vsyncpa [#allocation8 + $0x1], 1 }

</bundles_post_ra>
